<compile_context>
chip_gen: v7x
topology: tpu7x:2x2x1
jax: 0.10.0
libtpu: 0.0.40
codegen_flags: <defaults>
</compile_context>

<pallas_src>
import jax
import jax.numpy as jnp
from jax.experimental import pallas as pl
from jax.experimental.pallas import tpu as pltpu


@jax.jit
def conv3x3_relu_pallas(x_nchw, weight, bias):
    """'ca' branch: Conv2d(kernel=KHxKW, stride=1, padding='same') + ReLU, NCHW in/out."""
    B, C, H, W = x_nchw.shape
    Co, Cw, KH, KW = weight.shape
    assert C == Cw and KH % 2 == 1 and KW % 2 == 1
    ph, pw = KH // 2, KW // 2
    Hp, Wp = H + 2 * ph, W + 2 * pw
    Ca = C + 1                                        # +1 ones-channel carrying the bias
    Co_pad = max(128, ((Co + 127) // 128) * 128)      # lane-dense output width
    HW = H * W

    # ---- glue (cheap, no 9x blow-up): NHWC + ones channel, bf16, spatial pad ----
    x_nhwc = jnp.transpose(x_nchw, (0, 2, 3, 1))
    ones = jnp.ones((B, H, W, 1), x_nhwc.dtype)
    x_aug = jnp.concatenate([x_nhwc, ones], axis=-1).astype(jnp.bfloat16)
    x_pad = jnp.pad(x_aug, ((0, 0), (ph, ph), (pw, pw), (0, 0)))       # [B, Hp, Wp, Ca]

    # ---- weights as (kh*kw, Ca, Co_pad); bias lives in the center tap's ones-row ----
    w_taps = jnp.transpose(weight, (2, 3, 1, 0)).reshape(KH * KW, C, Co)
    w_aug = jnp.zeros((KH * KW, Ca, Co_pad), jnp.float32)
    w_aug = w_aug.at[:, :C, :Co].set(w_taps)
    w_aug = w_aug.at[ph * KW + pw, C, :Co].set(bias)
    w_aug = w_aug.astype(jnp.bfloat16)

    def kernel(x_ref, w_ref, o_ref):
        # x_ref: (1, Hp, Wp, Ca) bf16 | w_ref: (KH*KW, Ca, Co_pad) bf16
        # o_ref: (1, HW, Co_pad) f32
        x = x_ref[0]                                   # whole padded image for this batch
        acc = jnp.zeros((HW, Co_pad), jnp.float32)
        for t in range(KH * KW):                       # 9 shifted matmuls, f32 accumulate
            kh, kw = t // KW, t % KW
            win = x[kh:kh + H, kw:kw + W, :].reshape(HW, Ca)
            acc = acc + jnp.dot(win, w_ref[t], preferred_element_type=jnp.float32)
        o_ref[0] = jnp.maximum(acc, 0.0).astype(o_ref.dtype)   # ReLU ('a' in layout)

    # TODO(synk): for large H*W, tile the spatial rows with a halo (manual DMA /
    # pl.Element) instead of one whole image per grid step.
    out = pl.pallas_call(
        kernel,
        out_shape=jax.ShapeDtypeStruct((B, HW, Co_pad), jnp.float32),
        grid_spec=pltpu.PrefetchScalarGridSpec(
            num_scalar_prefetch=0,
            grid=(B,),                                 # >=2 steps -> both v7x TCs busy
            in_specs=[
                pl.BlockSpec((1, Hp, Wp, Ca), lambda b: (b, 0, 0, 0)),
                pl.BlockSpec((KH * KW, Ca, Co_pad), lambda b: (0, 0, 0)),
            ],
            out_specs=pl.BlockSpec((1, HW, Co_pad), lambda b: (b, 0, 0)),
        ),
        compiler_params=pltpu.CompilerParams(
            dimension_semantics=("parallel",),
            vmem_limit_bytes=32 * 1024 * 1024),
    )(x_pad, w_aug)

    out = out[:, :, :Co].reshape(B, H, W, Co)          # drop lane padding
    return jnp.transpose(out, (0, 3, 1, 2))            # back to NCHW


def branch_forward(x, params=None, layout=""):
    """Branch.forward: identity if no layout, else side ConvBlock (here: 'ca')."""
    if not layout:
        return x  # Branch without layout == nn.Identity()
    assert layout.replace(" ", "") == "ca", "only the 'ca' side-branch layout is implemented"
    # TODO(synk): other ConvBlock layout letters (n, p, S, branch combine ops, ...) not implemented.
    return conv3x3_relu_pallas(x, params["weight"], params["bias"])


if __name__ == "__main__":
    key = jax.random.PRNGKey(0)
    kx, kw, kb = jax.random.split(key, 3)

    B, C, H, W = 2, 4, 16, 16
    Co, KH, KW = 8, 3, 3

    x = jax.random.normal(kx, (B, C, H, W), dtype=jnp.float32)
    weight = jax.random.normal(kw, (Co, C, KH, KW), dtype=jnp.float32) * 0.1
    bias = jax.random.normal(kb, (Co,), dtype=jnp.float32) * 0.1
    params = {"weight": weight, "bias": bias}

    # Branch with a side conv-block (layout='ca').
    y = jax.block_until_ready(branch_forward(x, params, layout="ca"))
    assert y.shape == (B, Co, H, W)

    # Branch without layout: identity.
    y_id = jax.block_until_ready(branch_forward(x))
    assert y_id.shape == x.shape
    assert jnp.array_equal(y_id, x)

    # Reference with identical bf16-operand semantics (f32 accumulation), same as the kernel.
    ref = jax.lax.conv_general_dilated(
        x.astype(jnp.bfloat16), weight.astype(jnp.bfloat16),
        window_strides=(1, 1), padding="SAME",
        dimension_numbers=("NCHW", "OIHW", "NCHW"),
        preferred_element_type=jnp.float32)
    b_bf = bias.astype(jnp.bfloat16).astype(jnp.float32)
    ref = jax.nn.relu(ref + b_bf.reshape(1, Co, 1, 1))
    err = float(jnp.max(jnp.abs(y - ref)))
    assert jnp.allclose(y, ref, atol=1e-3, rtol=1e-3), err

    print("KERNEL_OK")
</pallas_src>

<mosaic_0001>
module attributes {stable_mosaic.version = 11 : i64} {
  func.func @kernel(%arg0: i32, %arg1: memref<1x18x18x5xbf16, #tpu.memory_space<vmem>>, %arg2: memref<9x5x128xbf16, #tpu.memory_space<vmem>>, %arg3: memref<1x256x128xf32, #tpu.memory_space<vmem>>) attributes {dimension_semantics = [#tpu.dimension_semantics<parallel>], iteration_bounds = array<i64: 2>, scalar_prefetch = 0 : i64, scratch_operands = 0 : i64, tpu.core_type = #tpu.core_type<tc>, window_params = [{transform_indices = @transform_0, window_bounds = array<i64: 1, 18, 18, 5>}, {pipeline_mode = #tpu.pipeline_mode<synchronous>, transform_indices = @transform_1, window_bounds = array<i64: 9, 5, 128>}, {transform_indices = @transform_2, window_bounds = array<i64: 1, 256, 128>}]} {
    %c0 = arith.constant 0 : index
    %c0_0 = arith.constant 0 : index
    %c0_1 = arith.constant 0 : index
    %c0_2 = arith.constant 0 : index
    %0 = vector.load %arg1[%c0, %c0_0, %c0_1, %c0_2] : memref<1x18x18x5xbf16, #tpu.memory_space<vmem>>, vector<1x18x18x5xbf16>
    %1 = vector.shape_cast %0 : vector<1x18x18x5xbf16> to vector<18x18x5xbf16>
    %cst = arith.constant 0.000000e+00 : f32
    %2 = vector.broadcast %cst : f32 to vector<256x128xf32>
    %3 = vector.extract_strided_slice %1 {offsets = [0, 0, 0], sizes = [16, 16, 5], strides = [1, 1, 1]} : vector<18x18x5xbf16> to vector<16x16x5xbf16>
    %4 = vector.shape_cast %3 : vector<16x16x5xbf16> to vector<256x5xbf16>
    %c0_3 = arith.constant 0 : index
    %c0_4 = arith.constant 0 : index
    %c0_5 = arith.constant 0 : index
    %5 = vector.load %arg2[%c0_3, %c0_4, %c0_5] : memref<9x5x128xbf16, #tpu.memory_space<vmem>>, vector<1x5x128xbf16>
    %6 = vector.shape_cast %5 : vector<1x5x128xbf16> to vector<5x128xbf16>
    %cst_6 = arith.constant dense<0.000000e+00> : vector<256x128xf32>
    %7 = tpu.matmul %4, %6, %cst_6 {dimension_numbers = #tpu.dot_dimension_numbers<[1], [0], [0], [1], [0, 0, 1, 1], [], []>} : vector<256x5xbf16>, vector<5x128xbf16>, vector<256x128xf32> -> vector<256x128xf32>
    %8 = arith.addf %2, %7 : vector<256x128xf32>
    %9 = vector.extract_strided_slice %1 {offsets = [0, 1, 0], sizes = [16, 16, 5], strides = [1, 1, 1]} : vector<18x18x5xbf16> to vector<16x16x5xbf16>
    %10 = vector.shape_cast %9 : vector<16x16x5xbf16> to vector<256x5xbf16>
    %c1 = arith.constant 1 : index
    %c0_7 = arith.constant 0 : index
    %c0_8 = arith.constant 0 : index
    %11 = vector.load %arg2[%c1, %c0_7, %c0_8] : memref<9x5x128xbf16, #tpu.memory_space<vmem>>, vector<1x5x128xbf16>
    %12 = vector.shape_cast %11 : vector<1x5x128xbf16> to vector<5x128xbf16>
    %cst_9 = arith.constant dense<0.000000e+00> : vector<256x128xf32>
    %13 = tpu.matmul %10, %12, %cst_9 {dimension_numbers = #tpu.dot_dimension_numbers<[1], [0], [0], [1], [0, 0, 1, 1], [], []>} : vector<256x5xbf16>, vector<5x128xbf16>, vector<256x128xf32> -> vector<256x128xf32>
    %14 = arith.addf %8, %13 : vector<256x128xf32>
    %15 = vector.extract_strided_slice %1 {offsets = [0, 2, 0], sizes = [16, 16, 5], strides = [1, 1, 1]} : vector<18x18x5xbf16> to vector<16x16x5xbf16>
    %16 = vector.shape_cast %15 : vector<16x16x5xbf16> to vector<256x5xbf16>
    %c2 = arith.constant 2 : index
    %c0_10 = arith.constant 0 : index
    %c0_11 = arith.constant 0 : index
    %17 = vector.load %arg2[%c2, %c0_10, %c0_11] : memref<9x5x128xbf16, #tpu.memory_space<vmem>>, vector<1x5x128xbf16>
    %18 = vector.shape_cast %17 : vector<1x5x128xbf16> to vector<5x128xbf16>
    %cst_12 = arith.constant dense<0.000000e+00> : vector<256x128xf32>
    %19 = tpu.matmul %16, %18, %cst_12 {dimension_numbers = #tpu.dot_dimension_numbers<[1], [0], [0], [1], [0, 0, 1, 1], [], []>} : vector<256x5xbf16>, vector<5x128xbf16>, vector<256x128xf32> -> vector<256x128xf32>
    %20 = arith.addf %14, %19 : vector<256x128xf32>
    %21 = vector.extract_strided_slice %1 {offsets = [1, 0, 0], sizes = [16, 16, 5], strides = [1, 1, 1]} : vector<18x18x5xbf16> to vector<16x16x5xbf16>
    %22 = vector.shape_cast %21 : vector<16x16x5xbf16> to vector<256x5xbf16>
    %c3 = arith.constant 3 : index
    %c0_13 = arith.constant 0 : index
    %c0_14 = arith.constant 0 : index
    %23 = vector.load %arg2[%c3, %c0_13, %c0_14] : memref<9x5x128xbf16, #tpu.memory_space<vmem>>, vector<1x5x128xbf16>
    %24 = vector.shape_cast %23 : vector<1x5x128xbf16> to vector<5x128xbf16>
    %cst_15 = arith.constant dense<0.000000e+00> : vector<256x128xf32>
    %25 = tpu.matmul %22, %24, %cst_15 {dimension_numbers = #tpu.dot_dimension_numbers<[1], [0], [0], [1], [0, 0, 1, 1], [], []>} : vector<256x5xbf16>, vector<5x128xbf16>, vector<256x128xf32> -> vector<256x128xf32>
    %26 = arith.addf %20, %25 : vector<256x128xf32>
    %27 = vector.extract_strided_slice %1 {offsets = [1, 1, 0], sizes = [16, 16, 5], strides = [1, 1, 1]} : vector<18x18x5xbf16> to vector<16x16x5xbf16>
    %28 = vector.shape_cast %27 : vector<16x16x5xbf16> to vector<256x5xbf16>
    %c4 = arith.constant 4 : index
    %c0_16 = arith.constant 0 : index
    %c0_17 = arith.constant 0 : index
    %29 = vector.load %arg2[%c4, %c0_16, %c0_17] : memref<9x5x128xbf16, #tpu.memory_space<vmem>>, vector<1x5x128xbf16>
    %30 = vector.shape_cast %29 : vector<1x5x128xbf16> to vector<5x128xbf16>
    %cst_18 = arith.constant dense<0.000000e+00> : vector<256x128xf32>
    %31 = tpu.matmul %28, %30, %cst_18 {dimension_numbers = #tpu.dot_dimension_numbers<[1], [0], [0], [1], [0, 0, 1, 1], [], []>} : vector<256x5xbf16>, vector<5x128xbf16>, vector<256x128xf32> -> vector<256x128xf32>
    %32 = arith.addf %26, %31 : vector<256x128xf32>
    %33 = vector.extract_strided_slice %1 {offsets = [1, 2, 0], sizes = [16, 16, 5], strides = [1, 1, 1]} : vector<18x18x5xbf16> to vector<16x16x5xbf16>
    %34 = vector.shape_cast %33 : vector<16x16x5xbf16> to vector<256x5xbf16>
    %c5 = arith.constant 5 : index
    %c0_19 = arith.constant 0 : index
    %c0_20 = arith.constant 0 : index
    %35 = vector.load %arg2[%c5, %c0_19, %c0_20] : memref<9x5x128xbf16, #tpu.memory_space<vmem>>, vector<1x5x128xbf16>
    %36 = vector.shape_cast %35 : vector<1x5x128xbf16> to vector<5x128xbf16>
    %cst_21 = arith.constant dense<0.000000e+00> : vector<256x128xf32>
    %37 = tpu.matmul %34, %36, %cst_21 {dimension_numbers = #tpu.dot_dimension_numbers<[1], [0], [0], [1], [0, 0, 1, 1], [], []>} : vector<256x5xbf16>, vector<5x128xbf16>, vector<256x128xf32> -> vector<256x128xf32>
    %38 = arith.addf %32, %37 : vector<256x128xf32>
    %39 = vector.extract_strided_slice %1 {offsets = [2, 0, 0], sizes = [16, 16, 5], strides = [1, 1, 1]} : vector<18x18x5xbf16> to vector<16x16x5xbf16>
    %40 = vector.shape_cast %39 : vector<16x16x5xbf16> to vector<256x5xbf16>
    %c6 = arith.constant 6 : index
    %c0_22 = arith.constant 0 : index
    %c0_23 = arith.constant 0 : index
    %41 = vector.load %arg2[%c6, %c0_22, %c0_23] : memref<9x5x128xbf16, #tpu.memory_space<vmem>>, vector<1x5x128xbf16>
    %42 = vector.shape_cast %41 : vector<1x5x128xbf16> to vector<5x128xbf16>
    %cst_24 = arith.constant dense<0.000000e+00> : vector<256x128xf32>
    %43 = tpu.matmul %40, %42, %cst_24 {dimension_numbers = #tpu.dot_dimension_numbers<[1], [0], [0], [1], [0, 0, 1, 1], [], []>} : vector<256x5xbf16>, vector<5x128xbf16>, vector<256x128xf32> -> vector<256x128xf32>
    %44 = arith.addf %38, %43 : vector<256x128xf32>
    %45 = vector.extract_strided_slice %1 {offsets = [2, 1, 0], sizes = [16, 16, 5], strides = [1, 1, 1]} : vector<18x18x5xbf16> to vector<16x16x5xbf16>
    %46 = vector.shape_cast %45 : vector<16x16x5xbf16> to vector<256x5xbf16>
    %c7 = arith.constant 7 : index
    %c0_25 = arith.constant 0 : index
    %c0_26 = arith.constant 0 : index
    %47 = vector.load %arg2[%c7, %c0_25, %c0_26] : memref<9x5x128xbf16, #tpu.memory_space<vmem>>, vector<1x5x128xbf16>
    %48 = vector.shape_cast %47 : vector<1x5x128xbf16> to vector<5x128xbf16>
    %cst_27 = arith.constant dense<0.000000e+00> : vector<256x128xf32>
    %49 = tpu.matmul %46, %48, %cst_27 {dimension_numbers = #tpu.dot_dimension_numbers<[1], [0], [0], [1], [0, 0, 1, 1], [], []>} : vector<256x5xbf16>, vector<5x128xbf16>, vector<256x128xf32> -> vector<256x128xf32>
    %50 = arith.addf %44, %49 : vector<256x128xf32>
    %51 = vector.extract_strided_slice %1 {offsets = [2, 2, 0], sizes = [16, 16, 5], strides = [1, 1, 1]} : vector<18x18x5xbf16> to vector<16x16x5xbf16>
    %52 = vector.shape_cast %51 : vector<16x16x5xbf16> to vector<256x5xbf16>
    %c8 = arith.constant 8 : index
    %c0_28 = arith.constant 0 : index
    %c0_29 = arith.constant 0 : index
    %53 = vector.load %arg2[%c8, %c0_28, %c0_29] : memref<9x5x128xbf16, #tpu.memory_space<vmem>>, vector<1x5x128xbf16>
    %54 = vector.shape_cast %53 : vector<1x5x128xbf16> to vector<5x128xbf16>
    %cst_30 = arith.constant dense<0.000000e+00> : vector<256x128xf32>
    %55 = tpu.matmul %52, %54, %cst_30 {dimension_numbers = #tpu.dot_dimension_numbers<[1], [0], [0], [1], [0, 0, 1, 1], [], []>} : vector<256x5xbf16>, vector<5x128xbf16>, vector<256x128xf32> -> vector<256x128xf32>
    %56 = arith.addf %50, %55 : vector<256x128xf32>
    %cst_31 = arith.constant 0.000000e+00 : f32
    %57 = vector.broadcast %cst_31 : f32 to vector<256x128xf32>
    %58 = arith.maximumf %56, %57 : vector<256x128xf32>
    %c0_32 = arith.constant 0 : index
    %c0_33 = arith.constant 0 : index
    %c0_34 = arith.constant 0 : index
    %59 = vector.load %arg3[%c0_32, %c0_33, %c0_34] : memref<1x256x128xf32, #tpu.memory_space<vmem>>, vector<1x256x128xf32>
    %60 = vector.shape_cast %59 : vector<1x256x128xf32> to vector<256x128xf32>
    %61 = vector.shape_cast %58 : vector<256x128xf32> to vector<1x256x128xf32>
    tpu.vector_store %arg3[%c0_32, %c0_33, %c0_34], %61 {strides = array<i32>} : memref<1x256x128xf32, #tpu.memory_space<vmem>>, vector<1x256x128xf32>,
    return
  }
  func.func @transform_0(%arg0: i32) -> (i32, i32, i32, i32) {
    %c0_i32 = arith.constant 0 : i32
    %c0_i32_0 = arith.constant 0 : i32
    %c0_i32_1 = arith.constant 0 : i32
    %c0_i32_2 = arith.constant 0 : i32
    return %arg0, %c0_i32, %c0_i32_0, %c0_i32_1 : i32, i32, i32, i32
  }
  func.func @transform_1(%arg0: i32) -> (i32, i32, i32) {
    %c0_i32 = arith.constant 0 : i32
    %c0_i32_0 = arith.constant 0 : i32
    %c0_i32_1 = arith.constant 0 : i32
    %c0_i32_2 = arith.constant 0 : i32
    return %c0_i32, %c0_i32_0, %c0_i32_1 : i32, i32, i32
  }
  func.func @transform_2(%arg0: i32) -> (i32, i32, i32) {
    %c0_i32 = arith.constant 0 : i32
    %c0_i32_0 = arith.constant 0 : i32
    %c0_i32_1 = arith.constant 0 : i32
    return %arg0, %c0_i32, %c0_i32_0 : i32, i32, i32
  }
}

</mosaic_0001>

<bundles_post_ra>
// kernel: conv3x3_relu_pallas.1
= control target key start
LH: loop header
LB: loop body
LE: loop exit
PB: predicated region body
PF: predicated region fallthrough
CT: control target
= control target key end

     0   :  { %s3989_s9 = smov 0   ;;  %s4984_s0 = inlined_call_operand.vmem [shape: bf16[2,18,18,5], index: 0, kind: input, shape index: {}]   ;;  %s4985_s1 = inlined_call_operand.vmem [shape: bf16[9,5,128], index: 1, kind: input, shape index: {}]   ;;  %s4986_s2 = inlined_call_operand.vmem [shape: f32[2,256,128], index: 2, kind: output, shape index: {}]  }
   0x1 LB: > { %s2982_s10 = sadd.s32 4294967295, %s3971_s9   ;;  %p2986_p0 = scmp.ge.s32.totalorder %s3971_s9, 1  ;;  %s3971_s9 = sphi %s3989_s9, %s12_s9  }
   0x2   : > { %p112_p1 = scmp.lt.s32.totalorder %s3971_s9, 3 }
   0x4   : > { %p113_p2 = pnand %p2986_p0, %p112_p1 }
   0x6   : > { %116 = sbr.rel (%p113_p2) target bundleno = 551 (0x227), region = 28 }
   0xd   : > { %v2990_v0 = vld [vmem:[%s4985_s1 + $0x4] sm:$0x7]  ;;  %vm686_vm0 = vcmask 1041408   ;;  %vm687_vm1 = vcmask 1042432   ;;  %v3973_v1 = vmov 65535   ;;  %p134_p3 = scmp.lt.s32.totalorder %s2982_s10, 1 }
   0xe   : > { %v688_v2 = vsel %vm686_vm0, 4294967295, %v3973_v1  ;;  %v3122_v3 = vld [vmem:[%s4985_s1 + $0x10] sm:$0x7]  ;;  %v199_v5 = vld [vmem:[%s4985_s1] sm:$0x7]  ;;  %vm637_vm4 = vcmask 39936  }
   0xf   : > { %v4004_v4 = vsel %vm687_vm1, %v688_v2, 0  ;;  %s5069_s10 = smov (!%p134_p3, %s2982_s10), 1  ;;  %v3141_v9 = vld [vmem:[%s4985_s1 + $0x14] sm:$0x7]  ;;  %vm200_vm2 = vsmask.f32 3328 }
  0x10   : > { %v691_v6 = vand.u32 %v2990_v0, %v4004_v4  ;;  %v4011_v7 = vand.u32 %v3122_v3, %v4004_v4  ;;  %v4016_v8 = vand.u32 %v4004_v4, %v199_v5  ;;  %v4022_v10 = vand.u32 %v3141_v9, %v4004_v4  ;;  %s3934_s19 = smul.u32 216, %s5069_s10  ;;  %v3159_v11 = vld [vmem:[%s4985_s1 + $0x18] sm:$0x7]  ;;  %v3071_v12 = vld [vmem:[%s4985_s1 + $0x8] sm:$0x7]  ;;  %s3216_s5 = sshll.u32 %s5069_s10, 8 }
  0x11   : > { %vm201_vm3 = vsmask.f32 7440  ;;  %v3177_v13 = vld [vmem:[%s4985_s1 + $0x1c] sm:$0x7]  ;;  %v4064_v25 = vand.u32 %v3159_v11, %v4004_v4  ;;  %v4067_v26 = vand.u32 %v3071_v12, %v4004_v4  ;;  %vm1163_vm6 = vcmask 1046532   ;;  %s4947_s8 = scalar_lea.vmem %s4986_s2, %s3216_s5 }
  0x12   : > { %5020 = vst [vmem:[#allocation2_spill] sm:$0xff] %v4011_v7  ;;  %3370 = vmatprep.subr.bf16.mxu1 %v691_v6  ;;  %3506 = vmatprep.subr.bf16.mxu0 %v4011_v7  ;;  %s4030_s22 = scalar_lea.vmem %s4984_s0, %s3934_s19  ;;  %v4070_v27 = vand.u32 %v3177_v13, %v4004_v4  ;;  %vm4082_vm5 = vmor %vm200_vm2, %vm201_vm3 }
  0x13   : > { %3371 = vmatpush3.bf16.msra.mxu1 %v691_v6  ;;  %3507 = vmatpush3.bf16.msra.mxu0 %v4011_v7  ;;  %v4044_v14 = vld [vmem:[%s4030_s22] sm:$0xf]  ;;  %v4047_v15 = vld [vmem:[%s4030_s22 + $0x4] sm:$0xf]  ;;  %v147_v16 = vld [vmem:[%s4030_s22 + $0x8] sm:$0x1] }
  0x14   : > { %3404 = vmatprep.subr.bf16.mxu1 %v4016_v8  ;;  %3540 = vmatprep.subr.bf16.mxu0 %v4022_v10  ;;  %v204_v17 = vshrl.u32 %v4044_v14, 16  ;;  %v207_v18 = vshll.u32 %v4044_v14, 16  ;;  %v213_v19 = vshll.u32 %v4047_v15, 16  ;;  %v217_v20 = vshrl.u32 %v4047_v15, 16  ;;  %v4055_v21 = vld [vmem:[%s4030_s22 + $0xc] sm:$0xf]  ;;  %vm4251_vm7 = vmor %vm687_vm1, %vm1163_vm6 }
  0x15   : > { %v223_v22 = vshll.u32 %v147_v16, 16  ;;  %v4058_v23 = vld [vmem:[%s4030_s22 + $0x10] sm:$0xf]  ;;  %v4061_v24 = vld [vmem:[%s4030_s22 + $0x14] sm:$0x1]  ;;  %5021 = vst [vmem:[#allocation3_spill] sm:$0xff] %v4070_v27 }
  0x16   : > { %v206_v28 = vrot.slane %v204_v17, 4  ;;  %v209_v29 = vrot.slane %v207_v18, 5  ;;  %v215_v30 = vrot.slane %v213_v19, 5  ;;  %v219_v31 = vrot.slane %v217_v20, 4  ;;  %v4078_v40 = vld [vmem:[%s4030_s22 + $0x18] sm:$0xf] }
  0x17   : > { %v225_v32 = vrot.slane %v223_v22, 5  ;;  %v228_v33 = vshrl.u32 %v4055_v21, 16  ;;  %v231_v34 = vshll.u32 %v4055_v21, 16  ;;  %v237_v35 = vshll.u32 %v4058_v23, 16  ;;  %v4091_v46 = vld [vmem:[%s4030_s22 + $0x1c] sm:$0xf] }
  0x18   : > { %v210_v36 = vor.u32 %v209_v29, %v206_v28  ;;  %v220_v37 = vor.u32 %v219_v31, %v215_v30  ;;  %v241_v38 = vshrl.u32 %v4058_v23, 16  ;;  %v247_v39 = vshll.u32 %v4061_v24, 16  ;;  %v4095_v53 = vld [vmem:[%s4030_s22 + $0x20] sm:$0x1]  ;;  %v4105_v0 = vld [vmem:[%s4030_s22 + $0x24] sm:$0xf] }
  0x19   : > { %v230_v42 = vrot.slane %v228_v33, 4  ;;  %v233_v43 = vrot.slane %v231_v34, 5  ;;  %v239_v44 = vrot.slane %v237_v35, 5  ;;  %v4088_v45 = vcombine.low %v4055_v21, %v4058_v23  ;;  %v4110_v6 = vld [vmem:[%s4030_s22 + $0x28] sm:$0xf] }
  0x1a   : > { %v211_v47 = vrot.slane %v210_v36, 4  ;;  %v221_v48 = vrot.slane %v220_v37, 4  ;;  %v243_v49 = vrot.slane %v241_v38, 4  ;;  %v249_v50 = vrot.slane %v247_v39, 5  ;;  %v4118_v16 = vld [vmem:[%s4030_s22 + $0x2c] sm:$0x1] }
  0x1b   : > { %v234_v51 = vor.u32 %v233_v43, %v230_v42  ;;  %v1177_v52 = vrot.slane %v4061_v24, 5  ;;  %v252_v54 = vshrl.u32 %v4078_v40, 16  ;;  %v255_v55 = vshll.u32 %v4078_v40, 16  ;;  %v4124_v22 = vld [vmem:[%s4030_s22 + $0x30] sm:$0xf] }
  0x1c   : > { %v216_v56 = vsel %vm4082_vm5, %v211_v47, %v215_v30  ;;  %v226_v57 = vsel %vm4082_vm5, %v221_v48, %v225_v32  ;;  %v244_v58 = vor.u32 %v243_v49, %v239_v44  ;;  %v261_v59 = vshll.u32 %v4091_v46, 16  ;;  %v4131_v36 = vld [vmem:[%s4030_s22 + $0x34] sm:$0xf]  ;;  %v4138_v42 = vld [vmem:[%s4030_s22 + $0x38] sm:$0x1] }
  0x1d   : > { %v2991_v60 = vcombine.low %v216_v56, %v226_v57  ;;  %v235_v61 = vrot.slane %v234_v51, 4  ;;  %v254_v62 = vrot.slane %v252_v54, 4  ;;  %v257_v63 = vrot.slane %v255_v55, 5  ;;  %v4146_v56 = vld [vmem:[%s4030_s22 + $0x3c] sm:$0xf] }
  0x1e   : > { %v245_v1 = vrot.slane %v244_v58, 4  ;;  %v263_v2 = vrot.slane %v261_v59, 5  ;;  %v265_v3 = vshrl.u32 %v4091_v46, 16  ;;  %v271_v5 = vshll.u32 %v4095_v53, 16 }
  0x1f   : > { %3372 = vmatprep.mubr.msk.bf16.mxu1 %vm637_vm4, %v2991_v60  ;;  %v240_v9 = vsel %vm4082_vm5, %v235_v61, %v239_v44  ;;  %v258_v11 = vor.u32 %v257_v63, %v254_v62  ;;  %v1181_v12 = vrot.slane %v4091_v46, 5  ;;  %v1184_v13 = vrot.slane %v4095_v53, 5  ;;  %v4153_v60 = vld [vmem:[%s4030_s22 + $0x40] sm:$0xf] }
  0x20   : > { %v250_v17 = vsel %vm4082_vm5, %v245_v1, %v249_v50  ;;  %v267_v18 = vrot.slane %v265_v3, 4  ;;  %v273_v19 = vrot.slane %v271_v5, 5  ;;  %v276_v20 = vshrl.u32 %v4105_v0, 16 }
  0x21   : > { %v2992_v28 = vcombine.low %v240_v9, %v250_v17  ;;  %v259_v29 = vrot.slane %v258_v11, 4  ;;  %v279_v30 = vshll.u32 %v4105_v0, 16  ;;  %v285_v31 = vshll.u32 %v4110_v6, 16 }
  0x22   : > { %v268_v32 = vor.u32 %v267_v18, %v263_v2  ;;  %v278_v33 = vrot.slane %v276_v20, 4  ;;  %v289_v34 = vshrl.u32 %v4110_v6, 16  ;;  %v295_v35 = vshll.u32 %v4118_v16, 16  ;;  %v4165_v18 = vld [vmem:[%s4030_s22 + $0x44] sm:$0x1] }
  0x23   : > { %3508 = vmatprep.mubr.msk.bf16.mxu0 %vm637_vm4, %v2992_v28  ;;  %3373 = vmatmul.mubr.msk.bf16.vlgmr.msra.gmra.mrb[0].mxu1 %vm637_vm4, %v2992_v28  ;;  %v264_v37 = vsel %vm4082_vm5, %v259_v29, %v263_v2  ;;  %v281_v38 = vrot.slane %v279_v30, 5  ;;  %v287_v39 = vrot.slane %v285_v31, 5  ;;  %v300_v43 = vshrl.u32 %v4124_v22, 16  ;;  %v4170_v28 = vld [vmem:[%s4030_s22 + $0x48] sm:$0xf] }
  0x24   : > { %3405 = vmatpush3.bf16.msra.mxu1 %v4016_v8  ;;  %v269_v44 = vrot.slane %v268_v32, 4  ;;  %v291_v47 = vrot.slane %v289_v34, 4  ;;  %v297_v48 = vrot.slane %v295_v35, 5  ;;  %v303_v49 = vshll.u32 %v4124_v22, 16 }
  0x25   : > { %v282_v50 = vor.u32 %v281_v38, %v278_v33  ;;  %v302_v51 = vrot.slane %v300_v43, 4  ;;  %v309_v54 = vshll.u32 %v4131_v36, 16  ;;  %v313_v55 = vshrl.u32 %v4131_v36, 16  ;;  %3438 = vmatprep.subr.bf16.mxu1 %v4067_v26  ;;  %v4177_v33 = vld [vmem:[%s4030_s22 + $0x4c] sm:$0xf] }
  0x26   : > { %v274_v57 = vsel %vm4082_vm5, %v269_v44, %v273_v19  ;;  %v292_v58 = vor.u32 %v291_v47, %v287_v39  ;;  %v305_v8 = vrot.slane %v303_v49, 5  ;;  %v319_v59 = vshll.u32 %v4138_v42, 16  ;;  %v4193_v49 = vld [vmem:[%s4030_s22 + $0x50] sm:$0x1] }
  0x27   : > { %v4155_v61 = vcombine.low %v264_v37, %v274_v57  ;;  %v283_v62 = vrot.slane %v282_v50, 4  ;;  %v311_v63 = vrot.slane %v309_v54, 5  ;;  %v315_v1 = vrot.slane %v313_v55, 4  ;;  %v4198_v54 = vld [vmem:[%s4030_s22 + $0x54] sm:$0xf] }
  0x28   : > { %v293_v2 = vrot.slane %v292_v58, 4  ;;  %v306_v3 = vor.u32 %v305_v8, %v302_v51  ;;  %v321_v5 = vrot.slane %v319_v59, 5  ;;  %v324_v9 = vshrl.u32 %v4146_v56, 16  ;;  %5026 = vst [vmem:[#allocation6_spill] sm:$0xff] %v4198_v54  ;;  %v4203_v59 = vld [vmem:[%s4030_s22 + $0x58] sm:$0xf] }
  0x29   : > { %5024 = vst [vmem:[#allocation4_spill] sm:$0xff] %v4155_v61  ;;  %3509 = vmatmul.mubr.msk.bf16.vlgmr.msra.gmra.mrb[0].mxu0 %vm637_vm4, %v4155_v61  ;;  %3376 = vmatprep.mubr.msk.bf16.mxu1 %vm637_vm4, %v4155_v61  ;;  %v288_v11 = vsel %vm4082_vm5, %v283_v62, %v287_v39  ;;  %v316_v17 = vor.u32 %v315_v1, %v311_v63  ;;  %v327_v19 = vshll.u32 %v4146_v56, 16  ;;  %v333_v20 = vshll.u32 %v4153_v60, 16 }
  0x2a   : > { %3541 = vmatpush3.bf16.msra.mxu0 %v4022_v10  ;;  %v298_v29 = vsel %vm4082_vm5, %v293_v2, %v297_v48  ;;  %v307_v30 = vrot.slane %v306_v3, 4  ;;  %v326_v31 = vrot.slane %v324_v9, 4  ;;  %v337_v32 = vshrl.u32 %v4153_v60, 16  ;;  %5028 = vst [vmem:[#allocation8_spill] sm:$0xff] %v4203_v59 }
  0x2b   : > { %v4179_v34 = vcombine.low %v288_v11, %v298_v29  ;;  %v317_v35 = vrot.slane %v316_v17, 4  ;;  %v329_v37 = vrot.slane %v327_v19, 5  ;;  %v335_v38 = vrot.slane %v333_v20, 5  ;;  %3574 = vmatprep.subr.bf16.mxu0 %v4064_v25  ;;  %v4216_v29 = vld [vmem:[%s4030_s22 + $0x5c] sm:$0x1] }
  0x2c   : > { %v312_v10 = vsel %vm4082_vm5, %v307_v30, %v311_v63  ;;  %v339_v39 = vrot.slane %v337_v32, 4  ;;  %v343_v43 = vshll.u32 %v4165_v18, 16  ;;  %v348_v44 = vshrl.u32 %v4170_v28, 16 }
  0x2d   : > { %5025 = vst [vmem:[#allocation5_spill] sm:$0xff] %v4179_v34  ;;  %3512 = vmatprep.mubr.msk.bf16.mxu0 %vm637_vm4, %v4179_v34  ;;  %3377 = vmatmul.mubr.msk.bf16.gmra.mrb[4].mxu1 %vm637_vm4, %v4179_v34  ;;  %v322_v47 = vsel %vm4082_vm5, %v317_v35, %v321_v5  ;;  %v330_v48 = vor.u32 %v329_v37, %v326_v31  ;;  %v351_v50 = vshll.u32 %v4170_v28, 16  ;;  %v357_v51 = vshll.u32 %v4177_v33, 16  ;;  %v4220_v31 = vld [vmem:[%s4030_s22 + $0x60] sm:$0xf] }
  0x2e   : > { %v4200_v55 = vcombine.low %v312_v10, %v322_v47  ;;  %v340_v57 = vor.u32 %v339_v39, %v335_v38  ;;  %v345_v58 = vrot.slane %v343_v43, 5  ;;  %v350_v8 = vrot.slane %v348_v44, 4  ;;  %v4225_v39 = vld [vmem:[%s4030_s22 + $0x64] sm:$0xf]  ;;  %v4408_v34 = vld [vmem:[%s4030_s22 + $0xa0] sm:$0xf] }
  0x2f   : > { %v331_v62 = vrot.slane %v330_v48, 4  ;;  %v353_v63 = vrot.slane %v351_v50, 5  ;;  %v359_v1 = vrot.slane %v357_v51, 5  ;;  %v361_v2 = vshrl.u32 %v4177_v33, 16 }
  0x30   : > { %5027 = vst [vmem:[#allocation7_spill] sm:$0xff] %v4200_v55  ;;  %3380 = vmatprep.mubr.msk.bf16.mxu1 %vm637_vm4, %v4200_v55  ;;  %v341_v3 = vrot.slane %v340_v57, 4  ;;  %v367_v5 = vshll.u32 %v4193_v49, 16  ;;  %v372_v9 = vshrl.u32 %v4198_v54, 16  ;;  %v375_v11 = vshll.u32 %v4198_v54, 16 }
  0x31   : > { %3513 = vmatmul.mubr.msk.bf16.gmra.mrb[4].mxu0 %vm637_vm4, %v4200_v55  ;;  %v336_v17 = vsel %vm4082_vm5, %v331_v62, %v335_v38  ;;  %v354_v19 = vor.u32 %v353_v63, %v350_v8  ;;  %v363_v20 = vrot.slane %v361_v2, 4  ;;  %v381_v30 = vshll.u32 %v4203_v59, 16  ;;  %v4239_v62 = vld [vmem:[%s4030_s22 + $0x68] sm:$0x1] }
  0x32   : > { %v346_v32 = vsel %vm4082_vm5, %v341_v3, %v345_v58  ;;  %v369_v35 = vrot.slane %v367_v5, 5  ;;  %v374_v37 = vrot.slane %v372_v9, 4  ;;  %v377_v10 = vrot.slane %v375_v11, 5 }
  0x33   : > { %v4227_v43 = vcombine.low %v336_v17, %v346_v32  ;;  %v355_v38 = vrot.slane %v354_v19, 4  ;;  %v364_v44 = vor.u32 %v363_v20, %v359_v1  ;;  %v383_v47 = vrot.slane %v381_v30, 5 }
  0x34   : > { %v378_v48 = vor.u32 %v377_v10, %v374_v37  ;;  %v385_v50 = vshrl.u32 %v4203_v59, 16  ;;  %v391_v51 = vshll.u32 %v4216_v29, 16  ;;  %v396_v57 = vshrl.u32 %v4220_v31, 16 }
  0x35   : > { %5029 = vst [vmem:[#allocation9_spill] sm:$0xff] %v4227_v43  ;;  %3516 = vmatprep.mubr.msk.bf16.mxu0 %vm637_vm4, %v4227_v43  ;;  %3381 = vmatmul.mubr.msk.bf16.gmra.mrb[8].mxu1 %vm637_vm4, %v4227_v43  ;;  %v360_v58 = vsel %vm4082_vm5, %v355_v38, %v359_v1  ;;  %v365_v8 = vrot.slane %v364_v44, 4  ;;  %v399_v63 = vshll.u32 %v4220_v31, 16  ;;  %v405_v2 = vshll.u32 %v4225_v39, 16  ;;  %v4247_v1 = vld [vmem:[%s4030_s22 + $0x6c] sm:$0xf] }
  0x36   : > { %v379_v3 = vrot.slane %v378_v48, 4  ;;  %v387_v5 = vrot.slane %v385_v50, 4  ;;  %v393_v9 = vrot.slane %v391_v51, 5  ;;  %v398_v11 = vrot.slane %v396_v57, 4  ;;  %v4263_v57 = vld [vmem:[%s4030_s22 + $0x70] sm:$0xf] }
  0x37   : > { %v370_v17 = vsel %vm4082_vm5, %v365_v8, %v369_v35  ;;  %v401_v19 = vrot.slane %v399_v63, 5  ;;  %v407_v20 = vrot.slane %v405_v2, 5  ;;  %v409_v30 = vshrl.u32 %v4225_v39, 16 }
  0x38   : > { %v4255_v37 = vcombine.low %v360_v58, %v370_v17  ;;  %v384_v10 = vsel %vm4082_vm5, %v379_v3, %v383_v47  ;;  %v388_v38 = vor.u32 %v387_v5, %v383_v47  ;;  %v415_v35 = vshll.u32 %v4239_v62, 16 }
  0x39   : > { %v402_v44 = vor.u32 %v401_v19, %v398_v11  ;;  %v411_v48 = vrot.slane %v409_v30, 4  ;;  %v3056_v50 = vrot.slane %v4055_v21, 9  ;;  %v1174_v51 = vrot.slane %v4058_v23, 5  ;;  %v4276_v11 = vld [vmem:[%s4030_s22 + $0x74] sm:$0x1] }
  0x3a   : > { %5032 = vst [vmem:[#allocation10_spill] sm:$0xff] %v4255_v37  ;;  %3517 = vmatmul.mubr.msk.bf16.gmra.mrb[8].mxu0 %vm637_vm4, %v4255_v37  ;;  %3384 = vmatprep.mubr.msk.bf16.mxu1 %vm637_vm4, %v4255_v37  ;;  %v389_v58 = vrot.slane %v388_v38, 4  ;;  %v417_v8 = vrot.slane %v415_v35, 5  ;;  %v420_v47 = vshrl.u32 %v4247_v1, 16  ;;  %v423_v63 = vshll.u32 %v4247_v1, 16 }
  0x3b   : > { %v403_v2 = vrot.slane %v402_v44, 4  ;;  %v412_v3 = vor.u32 %v411_v48, %v407_v20  ;;  %v1175_v21 = vsel %vm4251_vm7, %v3056_v50, %v1174_v51  ;;  %v1176_v23 = vrot.slane %v1174_v51, 4 }
  0x3c   : > { %v394_v5 = vsel %vm4082_vm5, %v389_v58, %v393_v9  ;;  %v422_v17 = vrot.slane %v420_v47, 4  ;;  %v425_v19 = vrot.slane %v423_v63, 5  ;;  %v429_v30 = vshll.u32 %v4263_v57, 16  ;;  %v4288_v9 = vld [vmem:[%s4030_s22 + $0x78] sm:$0xf] }
  0x3d   : > { %v4279_v38 = vcombine.low %v384_v10, %v394_v5  ;;  %v408_v35 = vsel %vm4082_vm5, %v403_v2, %v407_v20  ;;  %v413_v44 = vrot.slane %v412_v3, 4  ;;  %v1178_v48 = vsel %vm4251_vm7, %v1176_v23, %v1177_v52  ;;  %v4304_v63 = vld [vmem:[%s4030_s22 + $0x7c] sm:$0xf]  ;;  %v4309_v23 = vld [vmem:[%s4030_s22 + $0x80] sm:$0x1] }
  0x3e   : > { %v4290_v50 = vcombine.low %v1175_v21, %v1178_v48  ;;  %v426_v51 = vor.u32 %v425_v19, %v422_v17  ;;  %v431_v58 = vrot.slane %v429_v30, 5  ;;  %v433_v47 = vshrl.u32 %v4263_v57, 16 }
  0x3f   : > { %5033 = vst [vmem:[#allocation11_spill] sm:$0xff] %v4279_v38  ;;  %3520 = vmatprep.mubr.msk.bf16.mxu0 %vm637_vm4, %v4279_v38  ;;  %3385 = vmatmul.mubr.msk.bf16.gmra.mrb[12].mxu1 %vm637_vm4, %v4279_v38  ;;  %v418_v24 = vsel %vm4082_vm5, %v413_v44, %v417_v8  ;;  %v439_v52 = vshll.u32 %v4276_v11, 16  ;;  %v3057_v20 = vrot.slane %v4078_v40, 9  ;;  %v1183_v10 = vrot.slane %v1181_v12, 4 }
  0x40   : > { %5034 = vst [vmem:[#allocation12_spill] sm:$0xff] %v4290_v50  ;;  %v4306_v2 = vcombine.low %v408_v35, %v418_v24  ;;  %v427_v3 = vrot.slane %v426_v51, 4  ;;  %v435_v21 = vrot.slane %v433_v47, 4  ;;  %v444_v5 = vshrl.u32 %v4288_v9, 16  ;;  %v4335_v24 = vld [vmem:[%s4030_s22 + $0x84] sm:$0xf] }
  0x41   : > { %v441_v17 = vrot.slane %v439_v52, 5  ;;  %v1182_v8 = vsel %vm4251_vm7, %v3057_v20, %v1181_v12  ;;  %v1185_v19 = vsel %vm4251_vm7, %v1183_v10, %v1184_v13  ;;  %v447_v30 = vshll.u32 %v4288_v9, 16 }
  0x42   : > { %5035 = vst [vmem:[#allocation13_spill] sm:$0xff] %v4306_v2  ;;  %3521 = vmatmul.mubr.msk.bf16.gmra.mrb[12].mxu0 %vm637_vm4, %v4306_v2  ;;  %3388 = vmatprep.mubr.msk.bf16.mxu1 %vm637_vm4, %v4306_v2  ;;  %v432_v35 = vsel %vm4082_vm5, %v427_v3, %v431_v58  ;;  %v436_v44 = vor.u32 %v435_v21, %v431_v58  ;;  %v446_v12 = vrot.slane %v444_v5, 4  ;;  %v453_v13 = vshll.u32 %v4304_v63, 16 }
  0x43   : > { %v4327_v48 = vcombine.low %v1182_v8, %v1185_v19  ;;  %3542 = vmatprep.mubr.msk.bf16.mxu0 %vm637_vm4, %v4290_v50  ;;  %v449_v53 = vrot.slane %v447_v30, 5  ;;  %v457_v51 = vshrl.u32 %v4304_v63, 16  ;;  %v463_v47 = vshll.u32 %v4309_v23, 16  ;;  %v4341_v19 = vld [vmem:[%s4030_s22 + $0x88] sm:$0xf] }
  0x44   : > { %v437_v52 = vrot.slane %v436_v44, 4  ;;  %v3058_v58 = vrot.slane %v4105_v0, 9  ;;  %v1188_v20 = vrot.slane %v4110_v6, 5  ;;  %v1191_v10 = vrot.slane %v4118_v16, 5 }
  0x45   : > { %5036 = vst [vmem:[#allocation14_spill] sm:$0xff] %v4327_v48  ;;  %v450_v3 = vor.u32 %v449_v53, %v446_v12  ;;  %v455_v21 = vrot.slane %v453_v13, 5  ;;  %v459_v5 = vrot.slane %v457_v51, 4  ;;  %v465_v8 = vrot.slane %v463_v47, 5  ;;  %v4351_v12 = vld [vmem:[%s4030_s22 + $0x8c] sm:$0x1] }
  0x46   : > { %v442_v30 = vsel %vm4082_vm5, %v437_v52, %v441_v17  ;;  %v1189_v2 = vsel %vm4251_vm7, %v3058_v58, %v1188_v20  ;;  %v1190_v44 = vrot.slane %v1188_v20, 4  ;;  %v468_v38 = vshrl.u32 %v4335_v24, 16 }
  0x47   : > { %v4348_v37 = vcombine.low %v432_v35, %v442_v30  ;;  %v451_v43 = vrot.slane %v450_v3, 4  ;;  %v460_v16 = vor.u32 %v459_v5, %v455_v21  ;;  %v471_v53 = vshll.u32 %v4335_v24, 16  ;;  %v4365_v3 = vld [vmem:[%s4030_s22 + $0x90] sm:$0xf] }
  0x48   : > { %v1192_v13 = vsel %vm4251_vm7, %v1190_v44, %v1191_v10  ;;  %v470_v51 = vrot.slane %v468_v38, 4  ;;  %v477_v17 = vshll.u32 %v4341_v19, 16  ;;  %v481_v47 = vshrl.u32 %v4341_v19, 16 }
  0x49   : > { %5037 = vst [vmem:[#allocation15_spill] sm:$0xff] %v4348_v37  ;;  %3389 = vmatmul.mubr.msk.bf16.gmra.mrb[16].mxu1 %vm637_vm4, %v4348_v37  ;;  %v456_v35 = vsel %vm4082_vm5, %v451_v43, %v455_v21  ;;  %v461_v52 = vrot.slane %v460_v16, 4  ;;  %v4362_v58 = vcombine.low %v1189_v2, %v1192_v13  ;;  %v473_v20 = vrot.slane %v471_v53, 5  ;;  %v4379_v16 = vld [vmem:[%s4030_s22 + $0x94] sm:$0xf] }
  0x4a   : > { %3543 = vmatmul.mubr.msk.bf16.vlgmr.msra.gmra.mrb[0].mxu0 %vm637_vm4, %v4327_v48  ;;  %v479_v38 = vrot.slane %v477_v17, 5  ;;  %v483_v10 = vrot.slane %v481_v47, 4  ;;  %v487_v5 = vshll.u32 %v4351_v12, 16  ;;  %v3059_v30 = vrot.slane %v4124_v22, 9  ;;  %v4384_v47 = vld [vmem:[%s4030_s22 + $0x98] sm:$0x1] }
  0x4b   : > { %5038 = vst [vmem:[#allocation16_spill] sm:$0xff] %v4362_v58  ;;  %3575 = vmatpush3.bf16.msra.mxu0 %v4064_v25  ;;  %v466_v43 = vsel %vm4082_vm5, %v461_v52, %v465_v8  ;;  %3546 = vmatprep.mubr.msk.bf16.mxu0 %vm637_vm4, %v4362_v58  ;;  %v474_v2 = vor.u32 %v473_v20, %v470_v51  ;;  %v1195_v21 = vrot.slane %v4131_v36, 5  ;;  %v1198_v44 = vrot.slane %v4138_v42, 5  ;;  %v4401_v37 = vld [vmem:[%s4030_s22 + $0x9c] sm:$0xf] }
  0x4c   : > { %v4381_v53 = vcombine.low %v456_v35, %v466_v43  ;;  %v484_v13 = vor.u32 %v483_v10, %v479_v38  ;;  %v489_v17 = vrot.slane %v487_v5, 5  ;;  %v492_v25 = vshrl.u32 %v4365_v3, 16  ;;  %3608 = vmatprep.subr.bf16.mxu0 %v4070_v27 }
  0x4d   : > { %v475_v8 = vrot.slane %v474_v2, 4  ;;  %v1196_v51 = vsel %vm4251_vm7, %v3059_v30, %v1195_v21  ;;  %v1197_v52 = vrot.slane %v1195_v21, 4  ;;  %v495_v42 = vshll.u32 %v4365_v3, 16 }
  0x4e   : > { %5039 = vst [vmem:[#allocation17_spill] sm:$0xff] %v4381_v53  ;;  %3392 = vmatprep.mubr.msk.bf16.mxu1 %vm637_vm4, %v4381_v53  ;;  %v485_v35 = vrot.slane %v484_v13, 4  ;;  %v494_v20 = vrot.slane %v492_v25, 4  ;;  %v501_v10 = vshll.u32 %v4379_v16, 16  ;;  %v505_v5 = vshrl.u32 %v4379_v16, 16 }
  0x4f   : > { %v480_v43 = vsel %vm4082_vm5, %v475_v8, %v479_v38  ;;  %v1199_v2 = vsel %vm4251_vm7, %v1197_v52, %v1198_v44  ;;  %v497_v30 = vrot.slane %v495_v42, 5  ;;  %v511_v21 = vshll.u32 %v4384_v47, 16 }
  0x50   : > { %v490_v53 = vsel %vm4082_vm5, %v485_v35, %v489_v17  ;;  %v4405_v13 = vcombine.low %v1196_v51, %v1199_v2  ;;  %v503_v25 = vrot.slane %v501_v10, 5  ;;  %v507_v55 = vrot.slane %v505_v5, 4  ;;  %v4421_v35 = vld [vmem:[%s4030_s22 + $0xa4] sm:$0x1] }
  0x51   : > { %v4410_v61 = vcombine.low %v480_v43, %v490_v53  ;;  %v498_v38 = vor.u32 %v497_v30, %v494_v20  ;;  %v513_v8 = vrot.slane %v511_v21, 5  ;;  %v3060_v44 = vrot.slane %v4146_v56, 9 }
  0x52   : > { %5040 = vst [vmem:[#allocation18_spill] sm:$0xff] %v4405_v13  ;;  %3547 = vmatmul.mubr.msk.bf16.gmra.mrb[4].mxu0 %vm637_vm4, %v4405_v13  ;;  %v508_v52 = vor.u32 %v507_v55, %v503_v25  ;;  %v1202_v42 = vrot.slane %v4153_v60, 5  ;;  %v1205_v17 = vrot.slane %v4165_v18, 5  ;;  %v516_v51 = vshrl.u32 %v4401_v37, 16  ;;  %v4431_v13 = vld [vmem:[%s4030_s22 + $0xa8] sm:$0xf] }
  0x53   : > { %5041 = vst [vmem:[#allocation19_spill] sm:$0xff] %v4410_v61  ;;  %3393 = vmatmul.mubr.msk.bf16.gmra.mrb[20].mxu1 %vm637_vm4, %v4410_v61  ;;  %v499_v53 = vrot.slane %v498_v38, 4  ;;  %v519_v20 = vshll.u32 %v4401_v37, 16  ;;  %v525_v10 = vshll.u32 %v4408_v34, 16  ;;  %v529_v55 = vshrl.u32 %v4408_v34, 16 }
  0x54   : > { %v509_v5 = vrot.slane %v508_v52, 4  ;;  %v1203_v18 = vsel %vm4251_vm7, %v3060_v44, %v1202_v42  ;;  %v1204_v43 = vrot.slane %v1202_v42, 4  ;;  %v518_v2 = vrot.slane %v516_v51, 4  ;;  %v4440_v42 = vld [vmem:[%s4030_s22 + $0xac] sm:$0xf] }
  0x55   : > { %v504_v30 = vsel %vm4082_vm5, %v499_v53, %v503_v25  ;;  %v521_v21 = vrot.slane %v519_v20, 5  ;;  %v527_v38 = vrot.slane %v525_v10, 5  ;;  %v531_v61 = vrot.slane %v529_v55, 4 }
  0x56   : > { %v514_v58 = vsel %vm4082_vm5, %v509_v5, %v513_v8  ;;  %v1206_v7 = vsel %vm4251_vm7, %v1204_v43, %v1205_v17  ;;  %v535_v52 = vshll.u32 %v4421_v35, 16  ;;  %v3061_v44 = vrot.slane %v4170_v28, 9 }
  0x57   : > { %v4442_v51 = vcombine.low %v504_v30, %v514_v58  ;;  %v4444_v25 = vcombine.low %v1203_v18, %v1206_v7  ;;  %v522_v53 = vor.u32 %v521_v21, %v518_v2  ;;  %v532_v20 = vor.u32 %v531_v61, %v527_v38  ;;  %v4454_v7 = vld [vmem:[%s4030_s22 + $0xb0] sm:$0x1] }
  0x58   : > { %v537_v10 = vrot.slane %v535_v52, 5  ;;  %v1209_v55 = vrot.slane %v4177_v33, 5  ;;  %v1212_v8 = vrot.slane %v4193_v49, 5  ;;  %v540_v17 = vshrl.u32 %v4431_v13, 16 }
  0x59   : > { %5042 = vst [vmem:[#allocation20_spill] sm:$0xff] %v4442_v51  ;;  %5043 = vst [vmem:[#allocation21_spill] sm:$0xff] %v4444_v25  ;;  %3396 = vmatprep.mubr.msk.bf16.mxu1 %vm637_vm4, %v4442_v51  ;;  %3550 = vmatprep.mubr.msk.bf16.mxu0 %vm637_vm4, %v4444_v25  ;;  %v523_v58 = vrot.slane %v522_v53, 4  ;;  %v533_v5 = vrot.slane %v532_v20, 4  ;;  %v543_v61 = vshll.u32 %v4431_v13, 16  ;;  %v549_v18 = vshll.u32 %v4440_v42, 16 }
  0x5a   : > { %v1210_v49 = vsel %vm4251_vm7, %v3061_v44, %v1209_v55  ;;  %v1211_v43 = vrot.slane %v1209_v55, 4  ;;  %v542_v2 = vrot.slane %v540_v17, 4  ;;  %v553_v30 = vshrl.u32 %v4440_v42, 16  ;;  %v4466_v51 = vld [vmem:[%s4030_s22 + $0xb4] sm:$0xf] }
  0x5b   : > { %v528_v21 = vsel %vm4082_vm5, %v523_v58, %v527_v38  ;;  %v538_v52 = vsel %vm4082_vm5, %v533_v5, %v537_v10  ;;  %v545_v53 = vrot.slane %v543_v61, 5  ;;  %v551_v20 = vrot.slane %v549_v18, 5  ;;  %v4478_v58 = vld [vmem:[%s4030_s22 + $0xb8] sm:$0xf] }
  0x5c   : > { %v4468_v25 = vcombine.low %v528_v21, %v538_v52  ;;  %v1213_v44 = vsel %vm4251_vm7, %v1211_v43, %v1212_v8  ;;  %v555_v55 = vrot.slane %v553_v30, 4  ;;  %v559_v17 = vshll.u32 %v4454_v7, 16  ;;  %v4484_v8 = vld [vmem:[%s4030_s22 + $0xbc] sm:$0x1] }
  0x5d   : > { %v4473_v48 = vcombine.low %v1210_v49, %v1213_v44  ;;  %v546_v50 = vor.u32 %v545_v53, %v542_v2  ;;  %v3062_v38 = vrot.slane %v4198_v54, 9  ;;  %v1216_v10 = vrot.slane %v4203_v59, 5 }
  0x5e   : > { %5044 = vst [vmem:[#allocation22_spill] sm:$0xff] %v4468_v25  ;;  %3397 = vmatmul.mubr.msk.bf16.gmra.mrb[24].mxu1 %vm637_vm4, %v4468_v25  ;;  %v556_v5 = vor.u32 %v555_v55, %v551_v20  ;;  %v561_v61 = vrot.slane %v559_v17, 5  ;;  %v1219_v18 = vrot.slane %v4216_v29, 5  ;;  %v564_v43 = vshrl.u32 %v4466_v51, 16 }
  0x5f   : > { %5045 = vst [vmem:[#allocation23_spill] sm:$0xff] %v4473_v48  ;;  %3551 = vmatmul.mubr.msk.bf16.gmra.mrb[8].mxu0 %vm637_vm4, %v4473_v48  ;;  %v547_v49 = vrot.slane %v546_v50, 4  ;;  %v1217_v2 = vsel %vm4251_vm7, %v3062_v38, %v1216_v10  ;;  %v1218_v30 = vrot.slane %v1216_v10, 4  ;;  %v567_v21 = vshll.u32 %v4466_v51, 16 }
  0x60   : > { %v557_v52 = vrot.slane %v556_v5, 4  ;;  %v566_v53 = vrot.slane %v564_v43, 4  ;;  %v573_v44 = vshll.u32 %v4478_v58, 16  ;;  %v577_v29 = vshrl.u32 %v4478_v58, 16 }
  0x61   : > { %v552_v55 = vsel %vm4082_vm5, %v547_v49, %v551_v20  ;;  %v1220_v17 = vsel %vm4251_vm7, %v1218_v30, %v1219_v18  ;;  %v569_v25 = vrot.slane %v567_v21, 5  ;;  %v583_v50 = vshll.u32 %v4484_v8, 16 }
  0x62   : > { %v562_v38 = vsel %vm4082_vm5, %v557_v52, %v561_v61  ;;  %v4501_v10 = vcombine.low %v1217_v2, %v1220_v17  ;;  %v575_v5 = vrot.slane %v573_v44, 5  ;;  %v579_v43 = vrot.slane %v577_v29, 4 }
  0x63   : > { %v4503_v48 = vcombine.low %v552_v55, %v562_v38  ;;  %v570_v27 = vor.u32 %v569_v25, %v566_v53  ;;  %v585_v54 = vrot.slane %v583_v50, 5  ;;  %v3063_v59 = vrot.slane %v4220_v31, 9 }
  0x64   : > { %3554 = vmatprep.mubr.msk.bf16.mxu0 %vm637_vm4, %v4501_v10  ;;  %v580_v20 = vor.u32 %v579_v43, %v575_v5  ;;  %v1223_v18 = vrot.slane %v4225_v39, 5  ;;  %v1226_v49 = vrot.slane %v4239_v62, 5  ;;  %v3064_v61 = vrot.slane %v4247_v1, 9 }
  0x65   : > { %3400 = vmatprep.mubr.msk.bf16.mxu1 %vm637_vm4, %v4503_v48  ;;  %v571_v2 = vrot.slane %v570_v27, 4  ;;  %v3023_v25 = vcombine.low %v4044_v14, %v4047_v15  ;;  %v1230_v30 = vrot.slane %v4263_v57, 5  ;;  %v1233_v21 = vrot.slane %v4276_v11, 5 }
  0x66   : > { %v581_v52 = vrot.slane %v580_v20, 4  ;;  %v1224_v53 = vsel %vm4251_vm7, %v3063_v59, %v1223_v18  ;;  %v1225_v44 = vrot.slane %v1223_v18, 4  ;;  %v1237_v62 = vrot.slane %v4304_v63, 5 }
  0x67   : > { %v576_v29 = vsel %vm4082_vm5, %v571_v2, %v575_v5  ;;  %v1231_v27 = vsel %vm4251_vm7, %v3064_v61, %v1230_v30  ;;  %v1232_v55 = vrot.slane %v1230_v30, 4  ;;  %v3065_v14 = vrot.slane %v4288_v9, 9 }
  0x68   : > { %v586_v15 = vsel %vm4082_vm5, %v581_v52, %v585_v54  ;;  %v1227_v11 = vsel %vm4251_vm7, %v1225_v44, %v1226_v49  ;;  %v1239_v17 = vrot.slane %v1237_v62, 4  ;;  %v1240_v59 = vrot.slane %v4309_v23, 5 }
  0x69   : > { %v4530_v50 = vcombine.low %v576_v29, %v586_v15  ;;  %v4532_v38 = vcombine.low %v1224_v53, %v1227_v11  ;;  %v1234_v5 = vsel %vm4251_vm7, %v1232_v55, %v1233_v21  ;;  %v3066_v20 = vrot.slane %v4335_v24, 9 }
  0x6a   : > { %v4536_v43 = vcombine.low %v1231_v27, %v1234_v5  ;;  %v1244_v18 = vrot.slane %v4341_v19, 5  ;;  %v1247_v54 = vrot.slane %v4351_v12, 5  ;;  %v1238_v23 = vsel %vm4251_vm7, %v3065_v14, %v1237_v62 }
  0x6b   : > { %3401 = vmatmul.mubr.msk.bf16.gmra.mrb[28].mxu1 %vm637_vm4, %v4530_v50  ;;  %3555 = vmatmul.mubr.msk.bf16.gmra.mrb[12].mxu0 %vm637_vm4, %v4532_v38  ;;  %v1241_v49 = vsel %vm4251_vm7, %v1239_v17, %v1240_v59  ;;  %v1251_v2 = vrot.slane %v4379_v16, 5  ;;  %v1258_v30 = vrot.slane %v4408_v34, 5  ;;  %v3067_v52 = vrot.slane %v4365_v3, 9 }
  0x6c   : > { %3406 = vmatprep.mubr.msk.bf16.mxu1 %vm637_vm4, %v3023_v25  ;;  %3558 = vmatprep.mubr.msk.bf16.mxu0 %vm637_vm4, %v4536_v43  ;;  %v1246_v61 = vrot.slane %v1244_v18, 4  ;;  %v1245_v21 = vsel %vm4251_vm7, %v3066_v20, %v1244_v18  ;;  %v4558_v25 = vcombine.low %v1238_v23, %v1241_v49  ;;  %v1254_v44 = vrot.slane %v4384_v47, 5 }
  0x6d   : > { %v1253_v53 = vrot.slane %v1251_v2, 4  ;;  %v4564_v62 = vcombine.low %v4078_v40, %v4091_v46  ;;  %v3068_v29 = vrot.slane %v4401_v37, 9  ;;  %v1260_v55 = vrot.slane %v1258_v30, 4 }
  0x6e   : > { %v1248_v12 = vsel %vm4251_vm7, %v1246_v61, %v1247_v54  ;;  %v1261_v14 = vrot.slane %v4421_v35, 5  ;;  %v1265_v15 = vrot.slane %v4440_v42, 5  ;;  %v1252_v47 = vsel %vm4251_vm7, %v3067_v52, %v1251_v2 }
  0x6f   : > { %v4567_v27 = vcombine.low %v1245_v21, %v1248_v12  ;;  %v1255_v40 = vsel %vm4251_vm7, %v1253_v53, %v1254_v44  ;;  %v4584_v46 = vcombine.low %v4105_v0, %v4110_v6  ;;  %v1259_v35 = vsel %vm4251_vm7, %v3068_v29, %v1258_v30 }
  0x70   : > { %v3069_v11 = vrot.slane %v4431_v13, 9  ;;  %v4591_v17 = vcombine.low %v4220_v31, %v4225_v39  ;;  %v1272_v59 = vrot.slane %v4478_v58, 5  ;;  %v4600_v0 = vcombine.low %v4247_v1, %v4263_v57  ;;  %v3104_v31 = vld [vmem:[%s4985_s1 + $0xc] sm:$0x7] }
  0x71   : > { %v4604_v6 = vcombine.low %v4288_v9, %v4304_v63  ;;  %v4609_v39 = vcombine.low %v1252_v47, %v1255_v40  ;;  %v1267_v5 = vrot.slane %v1265_v15, 4  ;;  %v1268_v20 = vrot.slane %v4454_v7, 5 }
  0x72   : > { %v4614_v18 = vcombine.low %v4335_v24, %v4341_v19  ;;  %v4618_v1 = vcombine.low %v4365_v3, %v4379_v16  ;;  %v4622_v57 = vcombine.low %v4401_v37, %v4408_v34  ;;  %v4626_v9 = vcombine.low %v4431_v13, %v4440_v42  ;;  %v4644_v13 = vld [vmem:[%s4030_s22 + $0xc4] sm:$0xf] }
  0x73   : > { %3407 = vmatmul.mubr.msk.bf16.vlgmr.msra.gmra.mrb[0].mxu1 %vm637_vm4, %v4088_v45  ;;  %3559 = vmatmul.mubr.msk.bf16.gmra.mrb[16].mxu0 %vm637_vm4, %v4558_v25  ;;  %v4630_v63 = vcombine.low %v4466_v51, %v4478_v58  ;;  %v4634_v24 = vcombine.low %v4124_v22, %v4131_v36  ;;  %v4639_v3 = vand.u32 %v3104_v31, %v4004_v4  ;;  %v3070_v34 = vrot.slane %v4466_v51, 9  ;;  %v4665_v58 = vld [vmem:[%s4030_s22 + $0xc0] sm:$0xf] }
  0x74   : > { %3439 = vmatpush3.bf16.msra.mxu1 %v4067_v26  ;;  %3410 = vmatprep.mubr.msk.bf16.mxu1 %vm637_vm4, %v4564_v62  ;;  %v1262_v26 = vsel %vm4251_vm7, %v1260_v55, %v1261_v14  ;;  %v1274_v37 = vrot.slane %v1272_v59, 4  ;;  %v1275_v16 = vrot.slane %v4484_v8, 5  ;;  %v1266_v22 = vsel %vm4251_vm7, %v3069_v11, %v1265_v15  ;;  %v195_v8 = vld [vmem:[%s4030_s22 + $0xc8] sm:$0x1] }
  0x75   : > { %3562 = vmatprep.mubr.msk.bf16.mxu0 %vm637_vm4, %v4567_v27  ;;  %v4636_v19 = vcombine.low %v1259_v35, %v1262_v26  ;;  %3472 = vmatprep.subr.bf16.mxu1 %v4639_v3  ;;  %v1269_v36 = vsel %vm4251_vm7, %v1267_v5, %v1268_v20  ;;  %v2008_v42 = vrot.slane %v4644_v13, 5  ;;  %v1273_v51 = vsel %vm4251_vm7, %v3070_v34, %v1272_v59  ;;  %v5046_v26 = vld [vmem:[#allocation8_spill] sm:$0xff]  ;;  %v5047_v59 = vld [vmem:[#allocation6_spill] sm:$0xff] }
  0x76   : > { %v1276_v7 = vsel %vm4251_vm7, %v1274_v37, %v1275_v16  ;;  %v4670_v54 = vcombine.low %v4146_v56, %v4153_v60  ;;  %v4672_v23 = vcombine.low %v1266_v22, %v1269_v36  ;;  %v4676_v49 = vcombine.low %v4170_v28, %v4177_v33  ;;  %v3196_v16 = vld [vmem:[%s4985_s1 + $0x20] sm:$0x7]  ;;  %v5048_v36 = vld [vmem:[#allocation3_spill] sm:$0xff] }
  0x77   : > { %v1778_v61 = vshrl.u32 %v4665_v58, 16  ;;  %v1781_v2 = vshll.u32 %v4665_v58, 16  ;;  %v1787_v30 = vshll.u32 %v4644_v13, 16  ;;  %v1791_v21 = vshrl.u32 %v4644_v13, 16 }
  0x78   : > { %v4682_v12 = vcombine.low %v1273_v51, %v1276_v7  ;;  %v3140_v52 = vrot.slane %v4665_v58, 9  ;;  %v2010_v56 = vrot.slane %v2008_v42, 4  ;;  %v2011_v60 = vrot.slane %v195_v8, 5  ;;  %v3963_v51 = vld [vmem:[%s4030_s22 + $0x8] sm:$0x1] }
  0x79   : > { %v1780_v53 = vrot.slane %v1778_v61, 4  ;;  %v1783_v44 = vrot.slane %v1781_v2, 5  ;;  %v1789_v29 = vrot.slane %v1787_v30, 5  ;;  %v1793_v55 = vrot.slane %v1791_v21, 4 }
  0x7a   : > { %v1797_v14 = vshll.u32 %v195_v8, 16  ;;  %v2009_v15 = vsel %vm4251_vm7, %v3140_v52, %v2008_v42  ;;  %v2012_v47 = vsel %vm4251_vm7, %v2010_v56, %v2011_v60  ;;  %v4699_v31 = vcombine.low %v5047_v59, %v5046_v26  ;;  %v3964_v8 = vld [vmem:[%s4030_s22] sm:$0xf]  ;;  %v5049_v56 = vld [vmem:[#allocation12_spill] sm:$0xff]  ;;  %v5062_v26 = vld [vmem:[#allocation13_spill] sm:$0xff] }
  0x7b   : > { %3411 = vmatmul.mubr.msk.bf16.gmra.mrb[4].mxu1 %vm637_vm4, %v4584_v46  ;;  %3563 = vmatmul.mubr.msk.bf16.gmra.mrb[20].mxu0 %vm637_vm4, %v4609_v39  ;;  %v1784_v28 = vor.u32 %v1783_v44, %v1780_v53  ;;  %v1794_v33 = vor.u32 %v1793_v55, %v1789_v29  ;;  %v4701_v5 = vcombine.low %v2009_v15, %v2012_v47  ;;  %v1170_v7 = vrot.slane %v3963_v51, 5  ;;  %v5050_v60 = vld [vmem:[#allocation14_spill] sm:$0xff]  ;;  %v5052_v44 = vld [vmem:[#allocation16_spill] sm:$0xff]  ;;  %v5054_v55 = vld [vmem:[#allocation21_spill] sm:$0xff] }
  0x7c   : > { %3414 = vmatprep.mubr.msk.bf16.mxu1 %vm637_vm4, %v4634_v24  ;;  %3566 = vmatprep.mubr.msk.bf16.mxu0 %vm637_vm4, %v4636_v19  ;;  %v1799_v11 = vrot.slane %v1797_v14, 5  ;;  %v2668_v22 = vand.u32 %v3196_v16, %v4004_v4  ;;  %v3962_v4 = vld [vmem:[%s4030_s22 + $0x4] sm:$0xf]  ;;  %v3055_v61 = vrot.slane %v3964_v8, 9  ;;  %v4794_v14 = vld [vmem:[%s4030_s22 + $0xd0] sm:$0xf] }
  0x7d   : > { %v1785_v40 = vrot.slane %v1784_v28, 4  ;;  %v1795_v35 = vrot.slane %v1794_v33, 4  ;;  %v1167_v42 = vrot.slane %v3962_v4, 5  ;;  %v5051_v53 = vld [vmem:[#allocation2_spill] sm:$0xff]  ;;  %v5055_v28 = vld [vmem:[#allocation23_spill] sm:$0xff]  ;;  %v5057_v15 = vld [vmem:[#allocation5_spill] sm:$0xff] }
  0x7e   : > { %v4791_v33 = vld [vmem:[%s4030_s22 + $0xcc] sm:$0xf]  ;;  %v5066_v4 = vld [vmem:[#allocation20_spill] sm:$0xff]  ;;  %v2654_v41 = vrot.slane %v4794_v14, 5 }
  0x7f   : > { %v1790_v20 = vsel %vm4082_vm5, %v1785_v40, %v1789_v29  ;;  %v1800_v34 = vsel %vm4082_vm5, %v1795_v35, %v1799_v11  ;;  %v1169_v2 = vrot.slane %v1167_v42, 4  ;;  %v1168_v30 = vsel %vm4251_vm7, %v3055_v61, %v1167_v42  ;;  %v5053_v29 = vld [vmem:[#allocation18_spill] sm:$0xff]  ;;  %v5058_v47 = vld [vmem:[#allocation7_spill] sm:$0xff]  ;;  %v5059_v40 = vld [vmem:[#allocation9_spill] sm:$0xff] }
  0x80   : > { %v4707_v37 = vcombine.low %v1790_v20, %v1800_v34  ;;  %v5060_v35 = vld [vmem:[#allocation10_spill] sm:$0xff]  ;;  %v5061_v11 = vld [vmem:[#allocation11_spill] sm:$0xff]  ;;  %v5064_v20 = vld [vmem:[#allocation17_spill] sm:$0xff]  ;;  %v2424_v16 = vshrl.u32 %v4791_v33, 16 }
  0x81   : > { %v1171_v21 = vsel %vm4251_vm7, %v1169_v2, %v1170_v7  ;;  %v5063_v59 = vld [vmem:[#allocation15_spill] sm:$0xff]  ;;  %v198_v8 = vld [vmem:[%s4030_s22 + $0xd4] sm:$0x1]  ;;  %v5067_v61 = vld [vmem:[#allocation22_spill] sm:$0xff] }
  0x82   : > { %v3072_v52 = vcombine.low %v1168_v30, %v1171_v21  ;;  %v5065_v34 = vld [vmem:[#allocation19_spill] sm:$0xff]  ;;  %v2443_v30 = vshll.u32 %v198_v8, 16 }
  0x83   : > { %3415 = vmatmul.mubr.msk.bf16.gmra.mrb[8].mxu1 %vm637_vm4, %v4670_v54  ;;  %3567 = vmatmul.mubr.msk.bf16.gmra.mrb[24].mxu0 %vm637_vm4, %v4672_v23 }
  0x84   : > { %3418 = vmatprep.mubr.msk.bf16.mxu1 %vm637_vm4, %v4676_v49  ;;  %3570 = vmatprep.mubr.msk.bf16.mxu0 %vm637_vm4, %v4682_v12 }
  0x8b   : > { %3419 = vmatmul.mubr.msk.bf16.gmra.mrb[12].mxu1 %vm637_vm4, %v4699_v31  ;;  %3571 = vmatmul.mubr.msk.bf16.gmra.mrb[28].mxu0 %vm637_vm4, %v4701_v5 }
  0x8c   : > { %3422 = vmatprep.mubr.msk.bf16.mxu1 %vm637_vm4, %v4591_v17  ;;  %3576 = vmatprep.mubr.msk.bf16.mxu0 %vm637_vm4, %v4564_v62 }
  0x93   : > { %3423 = vmatmul.mubr.msk.bf16.gmra.mrb[16].mxu1 %vm637_vm4, %v4600_v0  ;;  %3577 = vmatmul.mubr.msk.bf16.vlgmr.msra.gmra.mrb[0].mxu0 %vm637_vm4, %v4584_v46 }
  0x94   : > { %3609 = vmatpush3.bf16.msra.mxu0 %v5048_v36  ;;  %3426 = vmatprep.mubr.msk.bf16.mxu1 %vm637_vm4, %v4604_v6  ;;  %v2437_v36 = vshrl.u32 %v4794_v14, 16 }
  0x95   : > { %3580 = vmatprep.mubr.msk.bf16.mxu0 %vm637_vm4, %v4634_v24  ;;  %3642 = vmatprep.subr.bf16.mxu0 %v2668_v22 }
  0x96   : > { %v2439_v7 = vrot.slane %v2437_v36, 4 }
  0x9b   : > { %3427 = vmatmul.mubr.msk.bf16.gmra.mrb[20].mxu1 %vm637_vm4, %v4614_v18  ;;  %3581 = vmatmul.mubr.msk.bf16.gmra.mrb[4].mxu0 %vm637_vm4, %v4670_v54 }
  0x9c   : > { %3430 = vmatprep.mubr.msk.bf16.mxu1 %vm637_vm4, %v4618_v1  ;;  %3584 = vmatprep.mubr.msk.bf16.mxu0 %vm637_vm4, %v4676_v49 }
  0xa3   : > { %3431 = vmatmul.mubr.msk.bf16.gmra.mrb[24].mxu1 %vm637_vm4, %v4622_v57  ;;  %3585 = vmatmul.mubr.msk.bf16.gmra.mrb[8].mxu0 %vm637_vm4, %v4699_v31 }
  0xa4   : > { %3434 = vmatprep.mubr.msk.bf16.mxu1 %vm637_vm4, %v4626_v9  ;;  %3588 = vmatprep.mubr.msk.bf16.mxu0 %vm637_vm4, %v4591_v17 }
  0xab   : > { %3435 = vmatmul.mubr.msk.bf16.gmra.mrb[28].mxu1 %vm637_vm4, %v4630_v63  ;;  %3589 = vmatmul.mubr.msk.bf16.gmra.mrb[12].mxu0 %vm637_vm4, %v4600_v0 }
  0xac   : > { %3440 = vmatprep.mubr.msk.bf16.mxu1 %vm637_vm4, %v3072_v52  ;;  %3592 = vmatprep.mubr.msk.bf16.mxu0 %vm637_vm4, %v4604_v6 }
  0xb3   : > { %3441 = vmatmul.mubr.msk.bf16.vlgmr.msra.gmra.mrb[0].mxu1 %vm637_vm4, %v5049_v56  ;;  %3593 = vmatmul.mubr.msk.bf16.gmra.mrb[16].mxu0 %vm637_vm4, %v4614_v18  ;;  %v2445_v56 = vrot.slane %v2443_v30, 5 }
  0xb4   : > { %3473 = vmatpush3.bf16.msra.mxu1 %v4639_v3  ;;  %3444 = vmatprep.mubr.msk.bf16.mxu1 %vm637_vm4, %v5050_v60  ;;  %v4780_v3 = vcombine.low %v4665_v58, %v4644_v13  ;;  %v3160_v13 = vcombine.low %v4791_v33, %v4794_v14  ;;  %v5056_v58 = vld [vmem:[#allocation4_spill] sm:$0xff] }
  0xb5   : > { %3596 = vmatprep.mubr.msk.bf16.mxu0 %vm637_vm4, %v4618_v1  ;;  %3676 = vmatprep.subr.bf16.mxu1 %v5051_v53 }
  0xbb   : > { %3445 = vmatmul.mubr.msk.bf16.gmra.mrb[4].mxu1 %vm637_vm4, %v5052_v44  ;;  %3597 = vmatmul.mubr.msk.bf16.gmra.mrb[20].mxu0 %vm637_vm4, %v4622_v57 }
  0xbc   : > { %3448 = vmatprep.mubr.msk.bf16.mxu1 %vm637_vm4, %v5053_v29  ;;  %3600 = vmatprep.mubr.msk.bf16.mxu0 %vm637_vm4, %v4626_v9 }
  0xc3   : > { %3449 = vmatmul.mubr.msk.bf16.gmra.mrb[8].mxu1 %vm637_vm4, %v5054_v55  ;;  %3601 = vmatmul.mubr.msk.bf16.gmra.mrb[24].mxu0 %vm637_vm4, %v4630_v63 }
  0xc4   : > { %3452 = vmatprep.mubr.msk.bf16.mxu1 %vm637_vm4, %v5055_v28  ;;  %3604 = vmatprep.mubr.msk.bf16.mxu0 %vm637_vm4, %v4780_v3 }
  0xcb   : > { %3453 = vmatmul.mubr.msk.bf16.gmra.mrb[12].mxu1 %vm637_vm4, %v4501_v10  ;;  %3605 = vmatmul.mubr.msk.bf16.gmra.mrb[28].mxu0 %vm637_vm4, %v3160_v13 }
  0xcc   : > { %3456 = vmatprep.mubr.msk.bf16.mxu1 %vm637_vm4, %v4532_v38  ;;  %3610 = vmatprep.mubr.msk.bf16.mxu0 %vm637_vm4, %v5056_v58 }
  0xd3   : > { %3457 = vmatmul.mubr.msk.bf16.gmra.mrb[16].mxu1 %vm637_vm4, %v4536_v43  ;;  %3611 = vmatmul.mubr.msk.bf16.vlgmr.msra.gmra.mrb[0].mxu0 %vm637_vm4, %v5057_v15 }
  0xd4   : > { %3643 = vmatpush3.bf16.msra.mxu0 %v2668_v22  ;;  %3460 = vmatprep.mubr.msk.bf16.mxu1 %vm637_vm4, %v4558_v25  ;;  %v2427_v22 = vshll.u32 %v4791_v33, 16 }
  0xd5   : > { %3614 = vmatprep.mubr.msk.bf16.mxu0 %vm637_vm4, %v5058_v47 }
  0xd6   : > { %v2429_v42 = vrot.slane %v2427_v22, 5 }
  0xdb   : > { %3461 = vmatmul.mubr.msk.bf16.gmra.mrb[20].mxu1 %vm637_vm4, %v4567_v27  ;;  %3615 = vmatmul.mubr.msk.bf16.gmra.mrb[4].mxu0 %vm637_vm4, %v5059_v40 }
  0xdc   : > { %3464 = vmatprep.mubr.msk.bf16.mxu1 %vm637_vm4, %v4609_v39  ;;  %3618 = vmatprep.mubr.msk.bf16.mxu0 %vm637_vm4, %v5060_v35 }
  0xe3   : > { %3465 = vmatmul.mubr.msk.bf16.gmra.mrb[24].mxu1 %vm637_vm4, %v4636_v19  ;;  %3619 = vmatmul.mubr.msk.bf16.gmra.mrb[8].mxu0 %vm637_vm4, %v5061_v11 }
  0xe4   : > { %3468 = vmatprep.mubr.msk.bf16.mxu1 %vm637_vm4, %v4672_v23  ;;  %3622 = vmatprep.mubr.msk.bf16.mxu0 %vm637_vm4, %v5062_v26 }
  0xeb   : > { %3469 = vmatmul.mubr.msk.bf16.gmra.mrb[28].mxu1 %vm637_vm4, %v4682_v12  ;;  %3623 = vmatmul.mubr.msk.bf16.gmra.mrb[12].mxu0 %vm637_vm4, %v5063_v59 }
  0xec   : > { %3474 = vmatprep.mubr.msk.bf16.mxu1 %vm637_vm4, %v4088_v45  ;;  %3626 = vmatprep.mubr.msk.bf16.mxu0 %vm637_vm4, %v5064_v20  ;;  %v2433_v45 = vshll.u32 %v4794_v14, 16 }
  0xee   : > { %v2435_v51 = vrot.slane %v2433_v45, 5 }
  0xf0   : > { %v2440_v2 = vor.u32 %v2439_v7, %v2435_v51 }
  0xf2   : > { %v2441_v52 = vrot.slane %v2440_v2, 4 }
  0xf3   : > { %3475 = vmatmul.mubr.msk.bf16.vlgmr.msra.gmra.mrb[0].mxu1 %vm637_vm4, %v4564_v62  ;;  %3627 = vmatmul.mubr.msk.bf16.gmra.mrb[16].mxu0 %vm637_vm4, %v5065_v34  ;;  %v2426_v62 = vrot.slane %v2424_v16, 4 }
  0xf4   : > { %3677 = vmatpush3.bf16.msra.mxu1 %v5051_v53  ;;  %3478 = vmatprep.mubr.msk.bf16.mxu1 %vm637_vm4, %v4584_v46 }
  0xf5   : > { %3630 = vmatprep.mubr.msk.bf16.mxu0 %vm637_vm4, %v5066_v4  ;;  %v2430_v46 = vor.u32 %v2429_v42, %v2426_v62 }
  0xf7   : > { %v2431_v21 = vrot.slane %v2430_v46, 4 }
  0xfb   : > { %3479 = vmatmul.mubr.msk.bf16.gmra.mrb[4].mxu1 %vm637_vm4, %v4634_v24  ;;  %3631 = vmatmul.mubr.msk.bf16.gmra.mrb[20].mxu0 %vm637_vm4, %v5067_v61  ;;  %v2436_v24 = vsel %vm4082_vm5, %v2431_v21, %v2435_v51 }
  0xfc   : > { %3482 = vmatprep.mubr.msk.bf16.mxu1 %vm637_vm4, %v4670_v54  ;;  %3634 = vmatprep.mubr.msk.bf16.mxu0 %vm637_vm4, %v4503_v48  ;;  %v2446_v54 = vsel %vm4082_vm5, %v2441_v52, %v2445_v56 }
  0xfd   : > { %v3178_v53 = vcombine.low %v2436_v24, %v2446_v54 }
 0x103   : > { %3483 = vmatmul.mubr.msk.bf16.gmra.mrb[8].mxu1 %vm637_vm4, %v4676_v49  ;;  %3635 = vmatmul.mubr.msk.bf16.gmra.mrb[24].mxu0 %vm637_vm4, %v4530_v50 }
 0x104   : > { %3486 = vmatprep.mubr.msk.bf16.mxu1 %vm637_vm4, %v4699_v31  ;;  %3638 = vmatprep.mubr.msk.bf16.mxu0 %vm637_vm4, %v4707_v37 }
 0x10b   : > { %3487 = vmatmul.mubr.msk.bf16.gmra.mrb[12].mxu1 %vm637_vm4, %v4591_v17  ;;  %3639 = vmatmul.mubr.msk.bf16.gmra.mrb[28].mxu0 %vm637_vm4, %v3178_v53 }
 0x10c   : > { %3490 = vmatprep.mubr.msk.bf16.mxu1 %vm637_vm4, %v4600_v0  ;;  %3644 = vmatprep.mubr.msk.bf16.mxu0 %vm637_vm4, %v5050_v60 }
 0x113   : > { %3491 = vmatmul.mubr.msk.bf16.gmra.mrb[16].mxu1 %vm637_vm4, %v4604_v6  ;;  %3645 = vmatmul.mubr.msk.bf16.vlgmr.msra.gmra.mrb[0].mxu0 %vm637_vm4, %v5052_v44 }
 0x114   : > { %3494 = vmatprep.mubr.msk.bf16.mxu1 %vm637_vm4, %v4614_v18  ;;  %3648 = vmatprep.mubr.msk.bf16.mxu0 %vm637_vm4, %v5053_v29 }
 0x11b   : > { %3495 = vmatmul.mubr.msk.bf16.gmra.mrb[20].mxu1 %vm637_vm4, %v4618_v1  ;;  %3649 = vmatmul.mubr.msk.bf16.gmra.mrb[4].mxu0 %vm637_vm4, %v5054_v55 }
 0x11c   : > { %3498 = vmatprep.mubr.msk.bf16.mxu1 %vm637_vm4, %v4622_v57  ;;  %3652 = vmatprep.mubr.msk.bf16.mxu0 %vm637_vm4, %v5055_v28 }
 0x123   : > { %3499 = vmatmul.mubr.msk.bf16.gmra.mrb[24].mxu1 %vm637_vm4, %v4626_v9  ;;  %3653 = vmatmul.mubr.msk.bf16.gmra.mrb[8].mxu0 %vm637_vm4, %v4501_v10  ;;  %v3195_v10 = vrot.slane %v4791_v33, 9 }
 0x124   : > { %3502 = vmatprep.mubr.msk.bf16.mxu1 %vm637_vm4, %v4630_v63  ;;  %3656 = vmatprep.mubr.msk.bf16.mxu0 %vm637_vm4, %v4532_v38  ;;  %v2656_v38 = vrot.slane %v2654_v41, 4 }
 0x12b   : > { %3503 = vmatmul.mubr.msk.bf16.gmra.mrb[28].mxu1 %vm637_vm4, %v4780_v3  ;;  %3657 = vmatmul.mubr.msk.bf16.gmra.mrb[12].mxu0 %vm637_vm4, %v4536_v43  ;;  %v2657_v43 = vrot.slane %v198_v8, 5 }
 0x12c   : > { %3524 = vmatprep.mubr.msk.bf16.mxu1 %vm637_vm4, %v5063_v59  ;;  %3660 = vmatprep.mubr.msk.bf16.mxu0 %vm637_vm4, %v4558_v25  ;;  %v2655_v25 = vsel %vm4251_vm7, %v3195_v10, %v2654_v41 }
 0x133   : > { %3525 = vmatmul.mubr.msk.bf16.vlgmr.msra.gmra.mrb[16].mxu1 %vm637_vm4, %v5064_v20  ;;  %3661 = vmatmul.mubr.msk.bf16.gmra.mrb[16].mxu0 %vm637_vm4, %v4567_v27  ;;  %v2658_v27 = vsel %vm4251_vm7, %v2656_v38, %v2657_v43 }
 0x134   : > { %3528 = vmatprep.mubr.msk.bf16.mxu1 %vm637_vm4, %v5065_v34  ;;  %3664 = vmatprep.mubr.msk.bf16.mxu0 %vm637_vm4, %v4609_v39  ;;  %v3197_v17 = vcombine.low %v2655_v25, %v2658_v27 }
 0x13b   : > { %3529 = vmatmul.mubr.msk.bf16.gmra.mrb[20].mxu1 %vm637_vm4, %v5066_v4  ;;  %3665 = vmatmul.mubr.msk.bf16.gmra.mrb[20].mxu0 %vm637_vm4, %v4636_v19 }
 0x13c   : > { %3532 = vmatprep.mubr.msk.bf16.mxu1 %vm637_vm4, %v5067_v61  ;;  %3668 = vmatprep.mubr.msk.bf16.mxu0 %vm637_vm4, %v4672_v23 }
 0x143   : > { %3533 = vmatmul.mubr.msk.bf16.gmra.mrb[24].mxu1 %vm637_vm4, %v4503_v48  ;;  %3669 = vmatmul.mubr.msk.bf16.gmra.mrb[24].mxu0 %vm637_vm4, %v4682_v12 }
 0x144   : > { %3536 = vmatprep.mubr.msk.bf16.mxu1 %vm637_vm4, %v4530_v50  ;;  %3672 = vmatprep.mubr.msk.bf16.mxu0 %vm637_vm4, %v4701_v5 }
 0x14b   : > { %3537 = vmatmul.mubr.msk.bf16.gmra.mrb[28].mxu1 %vm637_vm4, %v4707_v37  ;;  %3673 = vmatmul.mubr.msk.bf16.gmra.mrb[28].mxu0 %vm637_vm4, %v3197_v17 }
 0x1c6   : > { %v3476_v48 = vpop.f32.mrb[0].mxu1 }
 0x1c7   : > { %v1618_v0 = vpop.f32.mrb[1].mxu1 }
 0x1c8   : > { %v3477_v6 = vpop.f32.mrb[2].mxu1 }
 0x1c9   : > { %v1621_v50 = vpop.f32.mrb[3].mxu1 }
 0x1ce   : > { %v3480_v39 = vpop.f32.mrb[4].mxu1 }
 0x1cf   : > { %v1634_v18 = vpop.f32.mrb[5].mxu1 }
 0x1d0   : > { %v3481_v1 = vpop.f32.mrb[6].mxu1 }
 0x1d1   : > { %v1637_v57 = vpop.f32.mrb[7].mxu1 }
 0x1d6   : > { %v3484_v9 = vpop.f32.mrb[8].mxu1 }
 0x1d7   : > { %v1650_v63 = vpop.f32.mrb[9].mxu1 }
 0x1d8   : > { %v3485_v19 = vpop.f32.mrb[10].mxu1 }
 0x1d9   : > { %v1653_v32 = vpop.f32.mrb[11].mxu1 }
 0x1de   : > { %v3488_v23 = vpop.f32.mrb[12].mxu1 }
 0x1df   : > { %v1666_v49 = vpop.f32.mrb[13].mxu1 }
 0x1e0   : > { %v3489_v12 = vpop.f32.mrb[14].mxu1 }
 0x1e1   : > { %v1669_v31 = vpop.f32.mrb[15].mxu1 }
 0x1e6   : > { %v3646_v5 = vpop.f32.mrb[0].mxu0 }
 0x1e7   : > { %v3678_v37 = vadd.f32 %v3646_v5, %v3476_v48  ;;  %v2704_v60 = vpop.f32.mrb[1].mxu0 }
 0x1e8   : > { %v3679_v44 = vadd.f32 %v2704_v60, %v1618_v0  ;;  %v3647_v29 = vpop.f32.mrb[2].mxu0 }
 0x1e9   : > { %v2865_v3 = vmax.f32 %v3678_v37, 0.0  ;;  %v3680_v55 = vadd.f32 %v3647_v29, %v3477_v6  ;;  %v2707_v28 = vpop.f32.mrb[3].mxu0 }
 0x1ea   : > { %v2863_v33 = vmax.f32 %v3679_v44, 0.0  ;;  %v3681_v14 = vadd.f32 %v2707_v28, %v1621_v50 }
 0x1eb   : > { %2897 = vst [vmem:[%s4947_s8 + $0x10] sm:$0xff] %v2865_v3  ;;  %v2866_v13 = vmax.f32 %v3680_v55, 0.0 }
 0x1ec   : > { %2895 = vst [vmem:[%s4947_s8] sm:$0xff] %v2863_v33  ;;  %v2864_v58 = vmax.f32 %v3681_v14, 0.0 }
 0x1ed   : > { %2898 = vst [vmem:[%s4947_s8 + $0x18] sm:$0xff] %v2866_v13 }
 0x1ee   : > { %2896 = vst [vmem:[%s4947_s8 + $0x8] sm:$0xff] %v2864_v58  ;;  %v3650_v15 = vpop.f32.mrb[4].mxu0 }
 0x1ef   : > { %v3682_v47 = vadd.f32 %v3650_v15, %v3480_v39  ;;  %v2720_v40 = vpop.f32.mrb[5].mxu0 }
 0x1f0   : > { %v3683_v35 = vadd.f32 %v2720_v40, %v1634_v18  ;;  %v3651_v11 = vpop.f32.mrb[6].mxu0 }
 0x1f1   : > { %v2869_v26 = vmax.f32 %v3682_v47, 0.0  ;;  %v3684_v59 = vadd.f32 %v3651_v11, %v3481_v1  ;;  %v2723_v20 = vpop.f32.mrb[7].mxu0 }
 0x1f2   : > { %v2867_v34 = vmax.f32 %v3683_v35, 0.0  ;;  %v3685_v16 = vadd.f32 %v2723_v20, %v1637_v57 }
 0x1f3   : > { %2901 = vst [vmem:[%s4947_s8 + $0x30] sm:$0xff] %v2869_v26  ;;  %v2870_v22 = vmax.f32 %v3684_v59, 0.0 }
 0x1f4   : > { %2899 = vst [vmem:[%s4947_s8 + $0x20] sm:$0xff] %v2867_v34  ;;  %v2868_v36 = vmax.f32 %v3685_v16, 0.0 }
 0x1f5   : > { %2902 = vst [vmem:[%s4947_s8 + $0x38] sm:$0xff] %v2870_v22 }
 0x1f6   : > { %2900 = vst [vmem:[%s4947_s8 + $0x28] sm:$0xff] %v2868_v36  ;;  %v3654_v45 = vpop.f32.mrb[8].mxu0 }
 0x1f7   : > { %v3686_v4 = vadd.f32 %v3654_v45, %v3484_v9  ;;  %v2736_v62 = vpop.f32.mrb[9].mxu0 }
 0x1f8   : > { %v3687_v42 = vadd.f32 %v2736_v62, %v1650_v63  ;;  %v3655_v51 = vpop.f32.mrb[10].mxu0 }
 0x1f9   : > { %v2873_v7 = vmax.f32 %v3686_v4, 0.0  ;;  %v3688_v8 = vadd.f32 %v3655_v51, %v3485_v19  ;;  %v2739_v61 = vpop.f32.mrb[11].mxu0 }
 0x1fa   : > { %v2871_v46 = vmax.f32 %v3687_v42, 0.0  ;;  %v3689_v2 = vadd.f32 %v2739_v61, %v1653_v32 }
 0x1fb   : > { %2905 = vst [vmem:[%s4947_s8 + $0x50] sm:$0xff] %v2873_v7  ;;  %v2874_v30 = vmax.f32 %v3688_v8, 0.0 }
 0x1fc   : > { %2903 = vst [vmem:[%s4947_s8 + $0x40] sm:$0xff] %v2871_v46  ;;  %v2872_v21 = vmax.f32 %v3689_v2, 0.0 }
 0x1fd   : > { %2906 = vst [vmem:[%s4947_s8 + $0x58] sm:$0xff] %v2874_v30 }
 0x1fe   : > { %2904 = vst [vmem:[%s4947_s8 + $0x48] sm:$0xff] %v2872_v21  ;;  %v3658_v52 = vpop.f32.mrb[12].mxu0 }
 0x1ff   : > { %v3690_v56 = vadd.f32 %v3658_v52, %v3488_v23  ;;  %v2752_v24 = vpop.f32.mrb[13].mxu0 }
 0x200   : > { %v3691_v54 = vadd.f32 %v2752_v24, %v1666_v49  ;;  %v3659_v53 = vpop.f32.mrb[14].mxu0 }
 0x201   : > { %v2877_v41 = vmax.f32 %v3690_v56, 0.0  ;;  %v3692_v10 = vadd.f32 %v3659_v53, %v3489_v12  ;;  %v2755_v38 = vpop.f32.mrb[15].mxu0 }
 0x202   : > { %v2875_v43 = vmax.f32 %v3691_v54, 0.0  ;;  %v3693_v25 = vadd.f32 %v2755_v38, %v1669_v31 }
 0x203   : > { %2909 = vst [vmem:[%s4947_s8 + $0x70] sm:$0xff] %v2877_v41  ;;  %v2878_v27 = vmax.f32 %v3692_v10, 0.0 }
 0x204   : > { %2907 = vst [vmem:[%s4947_s8 + $0x60] sm:$0xff] %v2875_v43  ;;  %v2876_v17 = vmax.f32 %v3693_v25, 0.0 }
 0x205   : > { %2910 = vst [vmem:[%s4947_s8 + $0x78] sm:$0xff] %v2878_v27 }
 0x206   : > { %2908 = vst [vmem:[%s4947_s8 + $0x68] sm:$0xff] %v2876_v17  ;;  %v3526_v48 = vpop.f32.mrb[16].mxu1  ;;  %v3662_v0 = vpop.f32.mrb[16].mxu0 }
 0x207   : > { %v3694_v6 = vadd.f32 %v3662_v0, %v3526_v48  ;;  %v1910_v50 = vpop.f32.mrb[17].mxu1  ;;  %v2768_v39 = vpop.f32.mrb[17].mxu0 }
 0x208   : > { %v3695_v18 = vadd.f32 %v2768_v39, %v1910_v50  ;;  %v3527_v1 = vpop.f32.mrb[18].mxu1  ;;  %v3663_v57 = vpop.f32.mrb[18].mxu0 }
 0x209   : > { %v2881_v9 = vmax.f32 %v3694_v6, 0.0  ;;  %v3696_v63 = vadd.f32 %v3663_v57, %v3527_v1  ;;  %v1913_v19 = vpop.f32.mrb[19].mxu1  ;;  %v2771_v32 = vpop.f32.mrb[19].mxu0 }
 0x20a   : > { %v2879_v23 = vmax.f32 %v3695_v18, 0.0  ;;  %v3697_v49 = vadd.f32 %v2771_v32, %v1913_v19 }
 0x20b   : > { %2913 = vst [vmem:[%s4947_s8 + $0x90] sm:$0xff] %v2881_v9  ;;  %v2882_v12 = vmax.f32 %v3696_v63, 0.0 }
 0x20c   : > { %2911 = vst [vmem:[%s4947_s8 + $0x80] sm:$0xff] %v2879_v23  ;;  %v2880_v31 = vmax.f32 %v3697_v49, 0.0 }
 0x20d   : > { %2914 = vst [vmem:[%s4947_s8 + $0x98] sm:$0xff] %v2882_v12 }
 0x20e   : > { %2912 = vst [vmem:[%s4947_s8 + $0x88] sm:$0xff] %v2880_v31  ;;  %v3530_v5 = vpop.f32.mrb[20].mxu1  ;;  %v3666_v37 = vpop.f32.mrb[20].mxu0 }
 0x20f   : > { %v3698_v60 = vadd.f32 %v3666_v37, %v3530_v5  ;;  %v1926_v44 = vpop.f32.mrb[21].mxu1  ;;  %v2784_v29 = vpop.f32.mrb[21].mxu0 }
 0x210   : > { %v3699_v3 = vadd.f32 %v2784_v29, %v1926_v44  ;;  %v3531_v55 = vpop.f32.mrb[22].mxu1  ;;  %v3667_v28 = vpop.f32.mrb[22].mxu0 }
 0x211   : > { %v2885_v33 = vmax.f32 %v3698_v60, 0.0  ;;  %v3700_v14 = vadd.f32 %v3667_v28, %v3531_v55  ;;  %v1929_v13 = vpop.f32.mrb[23].mxu1  ;;  %v2787_v58 = vpop.f32.mrb[23].mxu0 }
 0x212   : > { %v2883_v15 = vmax.f32 %v3699_v3, 0.0  ;;  %v3701_v47 = vadd.f32 %v2787_v58, %v1929_v13 }
 0x213   : > { %2917 = vst [vmem:[%s4947_s8 + $0xb0] sm:$0xff] %v2885_v33  ;;  %v2886_v40 = vmax.f32 %v3700_v14, 0.0 }
 0x214   : > { %2915 = vst [vmem:[%s4947_s8 + $0xa0] sm:$0xff] %v2883_v15  ;;  %v2884_v35 = vmax.f32 %v3701_v47, 0.0 }
 0x215   : > { %2918 = vst [vmem:[%s4947_s8 + $0xb8] sm:$0xff] %v2886_v40 }
 0x216   : > { %2916 = vst [vmem:[%s4947_s8 + $0xa8] sm:$0xff] %v2884_v35  ;;  %v3534_v11 = vpop.f32.mrb[24].mxu1  ;;  %v3670_v26 = vpop.f32.mrb[24].mxu0 }
 0x217   : > { %v3702_v59 = vadd.f32 %v3670_v26, %v3534_v11  ;;  %v1942_v20 = vpop.f32.mrb[25].mxu1  ;;  %v2800_v34 = vpop.f32.mrb[25].mxu0 }
 0x218   : > { %v3703_v16 = vadd.f32 %v2800_v34, %v1942_v20  ;;  %v3535_v22 = vpop.f32.mrb[26].mxu1  ;;  %v3671_v36 = vpop.f32.mrb[26].mxu0 }
 0x219   : > { %v2889_v45 = vmax.f32 %v3702_v59, 0.0  ;;  %v3704_v4 = vadd.f32 %v3671_v36, %v3535_v22  ;;  %v1945_v62 = vpop.f32.mrb[27].mxu1  ;;  %v2803_v42 = vpop.f32.mrb[27].mxu0 }
 0x21a   : > { %v2887_v51 = vmax.f32 %v3703_v16, 0.0  ;;  %v3705_v7 = vadd.f32 %v2803_v42, %v1945_v62 }
 0x21b   : > { %2921 = vst [vmem:[%s4947_s8 + $0xd0] sm:$0xff] %v2889_v45  ;;  %v2890_v8 = vmax.f32 %v3704_v4, 0.0 }
 0x21c   : > { %2919 = vst [vmem:[%s4947_s8 + $0xc0] sm:$0xff] %v2887_v51  ;;  %v2888_v61 = vmax.f32 %v3705_v7, 0.0 }
 0x21d   : > { %2922 = vst [vmem:[%s4947_s8 + $0xd8] sm:$0xff] %v2890_v8 }
 0x21e   : > { %2920 = vst [vmem:[%s4947_s8 + $0xc8] sm:$0xff] %v2888_v61  ;;  %v3538_v46 = vpop.f32.mrb[28].mxu1  ;;  %v3674_v2 = vpop.f32.mrb[28].mxu0 }
 0x21f   : > { %v3706_v30 = vadd.f32 %v3674_v2, %v3538_v46  ;;  %v1958_v21 = vpop.f32.mrb[29].mxu1  ;;  %v2816_v52 = vpop.f32.mrb[29].mxu0 }
 0x220   : > { %v3707_v56 = vadd.f32 %v2816_v52, %v1958_v21  ;;  %v3539_v24 = vpop.f32.mrb[30].mxu1  ;;  %v3675_v54 = vpop.f32.mrb[30].mxu0 }
 0x221   : > { %v2893_v53 = vmax.f32 %v3706_v30, 0.0  ;;  %v3708_v41 = vadd.f32 %v3675_v54, %v3539_v24  ;;  %v1961_v10 = vpop.f32.mrb[31].mxu1  ;;  %v2819_v38 = vpop.f32.mrb[31].mxu0 }
 0x222   : > { %v2891_v43 = vmax.f32 %v3707_v56, 0.0  ;;  %v3709_v25 = vadd.f32 %v2819_v38, %v1961_v10 }
 0x223   : > { %2925 = vst [vmem:[%s4947_s8 + $0xf0] sm:$0xff] %v2893_v53  ;;  %v2894_v27 = vmax.f32 %v3708_v41, 0.0 }
 0x224   : > { %2923 = vst [vmem:[%s4947_s8 + $0xe0] sm:$0xff] %v2891_v43  ;;  %v2892_v17 = vmax.f32 %v3709_v25, 0.0 }
 0x225   : > { %2926 = vst [vmem:[%s4947_s8 + $0xf8] sm:$0xff] %v2894_v27 }
 0x226   : > { %2924 = vst [vmem:[%s4947_s8 + $0xe8] sm:$0xff] %v2892_v17 }
 0x227 PF: > { %s12_s9 = sadd.s32 1, %s3971_s9  }
 0x228   : > { %p9_p4 = scmp.ge.s32.totalorder %s12_s9, 4  }
 0x22a   :  { %11 = sbr.rel (!%p9_p4) target bundleno = 1 (0x1), region = 66 }

</bundles_post_ra>
